<compile_context>
chip_gen: v5e
topology: v5e:2x2
jax: 0.10.0
libtpu: 0.0.40
codegen_flags: <defaults>
</compile_context>

<pallas_src>
import jax
import jax.numpy as jnp
from jax.experimental import pallas as pl
from jax.experimental.pallas import tpu as pltpu

# --- module hyper-parameters (from Discriminator.__init__) ---
TOTAL_LOCATIONS = 4210
TIME_SCALE = 48
LOC_DIM = 64
TIM_DIM = 8
ACT_DIM = 4
PRE_DIM = 8
STAY_DIM = 8
HID = 64
EMB_DIM = LOC_DIM + TIM_DIM + ACT_DIM + PRE_DIM + STAY_DIM  # 92

TILE_M_F32 = 2048    # rows per grid step for large N (f32 path)
TILE_M_BF16 = 4096   # rows per grid step for large N (bf16 path)


def _choose_tile_m(n_rows: int, compute_dtype) -> int:
    big = TILE_M_BF16 if compute_dtype == jnp.bfloat16 else TILE_M_F32
    if n_rows <= 256:
        # one small tile; output row stays a lane-dense multiple of 128
        return 256
    if n_rows <= 2 * big:
        # always >= 2 "parallel" grid steps so both v7x TensorCores get work
        half = -(-n_rows // 2)
        return ((half + 255) // 256) * 256
    return big


def disc_mlp_kernel(x_ref, idx_ref, t1_ref, a1_ref, s1_ref, p1_ref,
                    b1_ref, w2_ref, b2_ref, w3_ref, b3_ref,
                    w4t_ref, b4_ref, o_ref):
    cdt = w2_ref.dtype
    tm = x_ref.shape[0]
    idx = idx_ref[...]                                   # (tm, 4) int32

    def small_lookup(col, tab_ref):
        # One-hot MXU lookup of a tiny VMEM-resident, W1-folded table.
        # OOB-safe: an out-of-range index selects nothing (all-zero one-hot).
        n = tab_ref.shape[0]
        sel = idx[:, col:col + 1]                        # (tm, 1)
        oh = (jax.lax.broadcasted_iota(jnp.int32, (tm, n), 1) == sel).astype(cdt)
        return jnp.dot(oh, tab_ref[...], preferred_element_type=jnp.float32)

    # Layer 1 (folded): loc rows arrive pre-multiplied by W1_loc; the four
    # small embeddings are looked up from W1-folded tables inside the kernel.
    h = (x_ref[...].astype(jnp.float32)
         + small_lookup(0, t1_ref)      # tim
         + small_lookup(1, a1_ref)      # act
         + small_lookup(2, s1_ref)      # stay_time
         + small_lookup(3, p1_ref)      # pre_pos_count
         + b1_ref[...])
    h = jnp.maximum(h, 0.0).astype(cdt)
    h = jnp.dot(h, w2_ref[...], preferred_element_type=jnp.float32) + b2_ref[...]
    h = jnp.maximum(h, 0.0).astype(cdt)
    h = jnp.dot(h, w3_ref[...], preferred_element_type=jnp.float32) + b3_ref[...]
    h = jnp.maximum(h, 0.0).astype(cdt)
    # Final layer: contract w4^T (1, HID) against h's hidden dim so per-row
    # scores land lane-dense in a single (1, tile_m) output row.
    z = jax.lax.dot_general(w4t_ref[...], h,
                            dimension_numbers=(((1,), (1,)), ((), ())),
                            preferred_element_type=jnp.float32)   # (1, tm)
    o_ref[0] = jax.nn.sigmoid(z + b4_ref[...])


def init_params(key):
    ks = jax.random.split(key, 13)
    s = 0.05
    return {
        "loc_emb": jax.random.normal(ks[0], (TOTAL_LOCATIONS, LOC_DIM), jnp.float32) * s,
        "tim_emb": jax.random.normal(ks[1], (TIME_SCALE, TIM_DIM), jnp.float32) * s,
        "act_emb": jax.random.normal(ks[2], (4, ACT_DIM), jnp.float32) * s,
        "stay_emb": jax.random.normal(ks[3], (TIME_SCALE, STAY_DIM), jnp.float32) * s,
        "pre_emb": jax.random.normal(ks[4], (TIME_SCALE, PRE_DIM), jnp.float32) * s,
        # nn.Linear(in, out) -> weight stored as (in, out) for x @ W + b
        "w1": jax.random.normal(ks[5], (EMB_DIM, HID), jnp.float32) * s,
        "b1": jax.random.normal(ks[6], (1, HID), jnp.float32) * s,
        "w2": jax.random.normal(ks[7], (HID, HID), jnp.float32) * s,
        "b2": jax.random.normal(ks[8], (1, HID), jnp.float32) * s,
        "w3": jax.random.normal(ks[9], (HID, HID), jnp.float32) * s,
        "b3": jax.random.normal(ks[10], (1, HID), jnp.float32) * s,
        "w4": jax.random.normal(ks[11], (HID, 1), jnp.float32) * s,
        "b4": jax.random.normal(ks[12], (1, 1), jnp.float32) * s,
    }


def prepare_params(params, compute_dtype=jnp.float32):
    """One-time prep (hoisted out of the per-call forward): fold every
    embedding table through the first Linear layer (concat order of the
    PyTorch module: [loc, tim, act, stay, pre]) and cast matmul operands to
    the compute dtype (jnp.bfloat16 recommended on v6e/v7x/v5e).  Biases stay
    float32 and are added onto the f32 accumulators in-kernel."""
    cdt = compute_dtype
    hp = jax.lax.Precision.HIGHEST
    w1 = params["w1"]
    o = 0
    w1_loc = w1[o:o + LOC_DIM];  o += LOC_DIM
    w1_tim = w1[o:o + TIM_DIM];  o += TIM_DIM
    w1_act = w1[o:o + ACT_DIM];  o += ACT_DIM
    w1_stay = w1[o:o + STAY_DIM]; o += STAY_DIM
    w1_pre = w1[o:o + PRE_DIM];  o += PRE_DIM

    def fold(emb, w):
        return jnp.dot(emb, w, precision=hp)

    return {
        "xw": fold(params["loc_emb"], w1_loc).astype(cdt),    # (4210, HID)
        "t1": fold(params["tim_emb"], w1_tim).astype(cdt),    # (48, HID)
        "a1": fold(params["act_emb"], w1_act).astype(cdt),    # (4, HID)
        "s1": fold(params["stay_emb"], w1_stay).astype(cdt),  # (48, HID)
        "p1": fold(params["pre_emb"], w1_pre).astype(cdt),    # (48, HID)
        "b1": params["b1"].astype(jnp.float32),
        "w2": params["w2"].astype(cdt), "b2": params["b2"].astype(jnp.float32),
        "w3": params["w3"].astype(cdt), "b3": params["b3"].astype(jnp.float32),
        "w4t": params["w4"].T.astype(cdt),                    # (1, HID)
        "b4": params["b4"].astype(jnp.float32),
    }


@jax.jit
def discriminator_forward(prep, x_l, x_t, x_a, pre_pos_count, stay_time):
    B, S = x_l.shape
    N = B * S
    cdt = prep["w2"].dtype
    tile_m = _choose_tile_m(N, cdt)
    n_pad = pl.cdiv(N, tile_m) * tile_m
    n_tiles = n_pad // tile_m

    def flat_idx(a):
        a = a.reshape(N).astype(jnp.int32)
        return jnp.pad(a, (0, n_pad - N)) if n_pad != N else a

    li = flat_idx(x_l)
    # column order must match the kernel: [tim, act, stay, pre]
    idx = jnp.stack([flat_idx(x_t), flat_idx(x_a),
                     flat_idx(stay_time), flat_idx(pre_pos_count)], axis=-1)

    # Location rows, already folded through layer 1 -> (n_pad, HID).  This is
    # the only per-row activation that round-trips HBM; the small-table
    # lookups are fused into the kernel.
    x = prep["xw"][li]

    def res(r, c):                    # VMEM-resident block (constant index_map)
        return pl.BlockSpec((r, c), lambda i: (0, 0))

    out = pl.pallas_call(
        disc_mlp_kernel,
        out_shape=jax.ShapeDtypeStruct((n_tiles, 1, tile_m), jnp.float32),
        grid=(n_tiles,),
        in_specs=[
            pl.BlockSpec((tile_m, HID), lambda i: (i, 0)),   # folded loc rows
            pl.BlockSpec((tile_m, 4), lambda i: (i, 0)),     # packed small indices
            res(TIME_SCALE, HID),   # t1
            res(4, HID),            # a1
            res(TIME_SCALE, HID),   # s1
            res(TIME_SCALE, HID),   # p1
            res(1, HID),            # b1
            res(HID, HID),          # w2
            res(1, HID),            # b2
            res(HID, HID),          # w3
            res(1, HID),            # b3
            res(1, HID),            # w4^T
            res(1, 1),              # b4
        ],
        out_specs=pl.BlockSpec((1, 1, tile_m), lambda i: (i, 0, 0)),
        compiler_params=pltpu.CompilerParams(
            dimension_semantics=("parallel",)),
    )(x, idx, prep["t1"], prep["a1"], prep["s1"], prep["p1"],
      prep["b1"], prep["w2"], prep["b2"], prep["w3"], prep["b3"],
      prep["w4t"], prep["b4"])

    # unpack lane-dense rows back to (B, S, 1); padded rows are dropped
    return out.reshape(n_pad)[:N].reshape(B, S, 1)


def reference_forward(params, x_l, x_t, x_a, pre_pos_count, stay_time):
    hp = jax.lax.Precision.HIGHEST
    lemb = params["loc_emb"][x_l]
    temb = params["tim_emb"][x_t]
    aemb = params["act_emb"][x_a]
    semb = params["stay_emb"][stay_time]
    pemb = params["pre_emb"][pre_pos_count]
    x = jnp.concatenate([lemb, temb, aemb, semb, pemb], axis=-1)
    h = jax.nn.relu(jnp.dot(x, params["w1"], precision=hp) + params["b1"][0])
    h = jax.nn.relu(jnp.dot(h, params["w2"], precision=hp) + params["b2"][0])
    h = jax.nn.relu(jnp.dot(h, params["w3"], precision=hp) + params["b3"][0])
    return jax.nn.sigmoid(jnp.dot(h, params["w4"], precision=hp) + params["b4"][0])


if __name__ == "__main__":
    key = jax.random.PRNGKey(0)
    pkey, k1, k2, k3, k4, k5 = jax.random.split(key, 6)
    params = init_params(pkey)
    prep_f32 = prepare_params(params)                    # exact f32 path

    # small shape consistent with the module (batch=2, seq=8)
    B, S = 2, 8
    x_l = jax.random.randint(k1, (B, S), 0, TOTAL_LOCATIONS, dtype=jnp.int32)
    x_t = jax.random.randint(k2, (B, S), 0, TIME_SCALE, dtype=jnp.int32)
    x_a = jax.random.randint(k3, (B, S), 0, 4, dtype=jnp.int32)
    pre_pos_count = jax.random.randint(k4, (B, S), 0, TIME_SCALE, dtype=jnp.int32)
    stay_time = jax.random.randint(k5, (B, S), 0, TIME_SCALE, dtype=jnp.int32)

    out = discriminator_forward(prep_f32, x_l, x_t, x_a, pre_pos_count, stay_time)
    out = jax.block_until_ready(out)
    ref = reference_forward(params, x_l, x_t, x_a, pre_pos_count, stay_time)
    assert out.shape == (B, S, 1), out.shape
    assert jnp.allclose(out, ref, atol=1e-5, rtol=1e-5), "mismatch vs reference (small)"

    # second check: multi-tile path (N=1200 -> 2 parallel tiles) + row padding
    B2, S2 = 3, 400
    kk = jax.random.split(jax.random.PRNGKey(1), 5)
    x_l2 = jax.random.randint(kk[0], (B2, S2), 0, TOTAL_LOCATIONS, dtype=jnp.int32)
    x_t2 = jax.random.randint(kk[1], (B2, S2), 0, TIME_SCALE, dtype=jnp.int32)
    x_a2 = jax.random.randint(kk[2], (B2, S2), 0, 4, dtype=jnp.int32)
    ppc2 = jax.random.randint(kk[3], (B2, S2), 0, TIME_SCALE, dtype=jnp.int32)
    st2 = jax.random.randint(kk[4], (B2, S2), 0, TIME_SCALE, dtype=jnp.int32)
    out2 = discriminator_forward(prep_f32, x_l2, x_t2, x_a2, ppc2, st2)
    out2 = jax.block_until_ready(out2)
    ref2 = reference_forward(params, x_l2, x_t2, x_a2, ppc2, st2)
    assert out2.shape == (B2, S2, 1), out2.shape
    assert jnp.allclose(out2, ref2, atol=1e-5, rtol=1e-5), "mismatch vs reference (large)"

    # third check: bf16 memory-bound path (per review) at a loose tolerance
    prep_bf16 = prepare_params(params, jnp.bfloat16)
    out3 = discriminator_forward(prep_bf16, x_l2, x_t2, x_a2, ppc2, st2)
    out3 = jax.block_until_ready(out3)
    assert out3.shape == (B2, S2, 1), out3.shape
    assert jnp.allclose(out3, ref2, atol=2e-2, rtol=2e-2), "mismatch vs reference (bf16)"

    print("KERNEL_OK")
</pallas_src>

<mosaic_0001>
module attributes {stable_mosaic.version = 11 : i64} {
  func.func @disc_mlp_kernel(%arg0: i32, %arg1: memref<256x64xf32, #tpu.memory_space<vmem>>, %arg2: memref<256x4xi32, #tpu.memory_space<vmem>>, %arg3: memref<48x64xf32, #tpu.memory_space<vmem>>, %arg4: memref<4x64xf32, #tpu.memory_space<vmem>>, %arg5: memref<48x64xf32, #tpu.memory_space<vmem>>, %arg6: memref<48x64xf32, #tpu.memory_space<vmem>>, %arg7: memref<1x64xf32, #tpu.memory_space<vmem>>, %arg8: memref<64x64xf32, #tpu.memory_space<vmem>>, %arg9: memref<1x64xf32, #tpu.memory_space<vmem>>, %arg10: memref<64x64xf32, #tpu.memory_space<vmem>>, %arg11: memref<1x64xf32, #tpu.memory_space<vmem>>, %arg12: memref<1x64xf32, #tpu.memory_space<vmem>>, %arg13: memref<1x1xf32, #tpu.memory_space<vmem>>, %arg14: memref<1x1x256xf32, #tpu.memory_space<vmem>>) attributes {dimension_semantics = [#tpu.dimension_semantics<parallel>], iteration_bounds = array<i64: 1>, scalar_prefetch = 0 : i64, scratch_operands = 0 : i64, tpu.core_type = #tpu.core_type<tc>, window_params = [{transform_indices = @transform_0, window_bounds = array<i64: 256, 64>}, {transform_indices = @transform_1, window_bounds = array<i64: 256, 4>}, {pipeline_mode = #tpu.pipeline_mode<synchronous>, transform_indices = @transform_2, window_bounds = array<i64: 48, 64>}, {pipeline_mode = #tpu.pipeline_mode<synchronous>, transform_indices = @transform_3, window_bounds = array<i64: 4, 64>}, {pipeline_mode = #tpu.pipeline_mode<synchronous>, transform_indices = @transform_4, window_bounds = array<i64: 48, 64>}, {pipeline_mode = #tpu.pipeline_mode<synchronous>, transform_indices = @transform_5, window_bounds = array<i64: 48, 64>}, {pipeline_mode = #tpu.pipeline_mode<synchronous>, transform_indices = @transform_6, window_bounds = array<i64: 1, 64>}, {pipeline_mode = #tpu.pipeline_mode<synchronous>, transform_indices = @transform_7, window_bounds = array<i64: 64, 64>}, {pipeline_mode = #tpu.pipeline_mode<synchronous>, transform_indices = @transform_8, window_bounds = array<i64: 1, 64>}, {pipeline_mode = #tpu.pipeline_mode<synchronous>, transform_indices = @transform_9, window_bounds = array<i64: 64, 64>}, {pipeline_mode = #tpu.pipeline_mode<synchronous>, transform_indices = @transform_10, window_bounds = array<i64: 1, 64>}, {pipeline_mode = #tpu.pipeline_mode<synchronous>, transform_indices = @transform_11, window_bounds = array<i64: 1, 64>}, {pipeline_mode = #tpu.pipeline_mode<synchronous>, transform_indices = @transform_12, window_bounds = array<i64: 1, 1>}, {transform_indices = @transform_13, window_bounds = array<i64: 1, 1, 256>}]} {
    %c0 = arith.constant 0 : index
    %c0_0 = arith.constant 0 : index
    %0 = vector.load %arg2[%c0, %c0_0] : memref<256x4xi32, #tpu.memory_space<vmem>>, vector<256x4xi32>
    %c0_1 = arith.constant 0 : index
    %c0_2 = arith.constant 0 : index
    %1 = vector.load %arg1[%c0_1, %c0_2] : memref<256x64xf32, #tpu.memory_space<vmem>>, vector<256x64xf32>
    %2 = vector.extract_strided_slice %0 {offsets = [0, 0], sizes = [256, 1], strides = [1, 1]} : vector<256x4xi32> to vector<256x1xi32>
    %3 = tpu.iota {dimensions = array<i32: 1>} : vector<256x48xi32>
    %4 = vector.broadcast %2 : vector<256x1xi32> to vector<256x48xi32>
    %5 = arith.cmpi eq, %3, %4 : vector<256x48xi32>
    %6 = arith.extui %5 : vector<256x48xi1> to vector<256x48xi32>
    %7 = arith.sitofp %6 : vector<256x48xi32> to vector<256x48xf32>
    %c0_3 = arith.constant 0 : index
    %c0_4 = arith.constant 0 : index
    %8 = vector.load %arg3[%c0_3, %c0_4] : memref<48x64xf32, #tpu.memory_space<vmem>>, vector<48x64xf32>
    %cst = arith.constant dense<0.000000e+00> : vector<256x64xf32>
    %9 = tpu.matmul %7, %8, %cst {dimension_numbers = #tpu.dot_dimension_numbers<[1], [0], [0], [1], [0, 0, 1, 1], [], []>} : vector<256x48xf32>, vector<48x64xf32>, vector<256x64xf32> -> vector<256x64xf32>
    %10 = arith.addf %1, %9 : vector<256x64xf32>
    %11 = vector.extract_strided_slice %0 {offsets = [0, 1], sizes = [256, 1], strides = [1, 1]} : vector<256x4xi32> to vector<256x1xi32>
    %12 = tpu.iota {dimensions = array<i32: 1>} : vector<256x4xi32>
    %13 = vector.broadcast %11 : vector<256x1xi32> to vector<256x4xi32>
    %14 = arith.cmpi eq, %12, %13 : vector<256x4xi32>
    %15 = arith.extui %14 : vector<256x4xi1> to vector<256x4xi32>
    %16 = arith.sitofp %15 : vector<256x4xi32> to vector<256x4xf32>
    %c0_5 = arith.constant 0 : index
    %c0_6 = arith.constant 0 : index
    %17 = vector.load %arg4[%c0_5, %c0_6] : memref<4x64xf32, #tpu.memory_space<vmem>>, vector<4x64xf32>
    %cst_7 = arith.constant dense<0.000000e+00> : vector<256x64xf32>
    %18 = tpu.matmul %16, %17, %cst_7 {dimension_numbers = #tpu.dot_dimension_numbers<[1], [0], [0], [1], [0, 0, 1, 1], [], []>} : vector<256x4xf32>, vector<4x64xf32>, vector<256x64xf32> -> vector<256x64xf32>
    %19 = arith.addf %10, %18 : vector<256x64xf32>
    %20 = vector.extract_strided_slice %0 {offsets = [0, 2], sizes = [256, 1], strides = [1, 1]} : vector<256x4xi32> to vector<256x1xi32>
    %21 = tpu.iota {dimensions = array<i32: 1>} : vector<256x48xi32>
    %22 = vector.broadcast %20 : vector<256x1xi32> to vector<256x48xi32>
    %23 = arith.cmpi eq, %21, %22 : vector<256x48xi32>
    %24 = arith.extui %23 : vector<256x48xi1> to vector<256x48xi32>
    %25 = arith.sitofp %24 : vector<256x48xi32> to vector<256x48xf32>
    %c0_8 = arith.constant 0 : index
    %c0_9 = arith.constant 0 : index
    %26 = vector.load %arg5[%c0_8, %c0_9] : memref<48x64xf32, #tpu.memory_space<vmem>>, vector<48x64xf32>
    %cst_10 = arith.constant dense<0.000000e+00> : vector<256x64xf32>
    %27 = tpu.matmul %25, %26, %cst_10 {dimension_numbers = #tpu.dot_dimension_numbers<[1], [0], [0], [1], [0, 0, 1, 1], [], []>} : vector<256x48xf32>, vector<48x64xf32>, vector<256x64xf32> -> vector<256x64xf32>
    %28 = arith.addf %19, %27 : vector<256x64xf32>
    %29 = vector.extract_strided_slice %0 {offsets = [0, 3], sizes = [256, 1], strides = [1, 1]} : vector<256x4xi32> to vector<256x1xi32>
    %30 = tpu.iota {dimensions = array<i32: 1>} : vector<256x48xi32>
    %31 = vector.broadcast %29 : vector<256x1xi32> to vector<256x48xi32>
    %32 = arith.cmpi eq, %30, %31 : vector<256x48xi32>
    %33 = arith.extui %32 : vector<256x48xi1> to vector<256x48xi32>
    %34 = arith.sitofp %33 : vector<256x48xi32> to vector<256x48xf32>
    %c0_11 = arith.constant 0 : index
    %c0_12 = arith.constant 0 : index
    %35 = vector.load %arg6[%c0_11, %c0_12] : memref<48x64xf32, #tpu.memory_space<vmem>>, vector<48x64xf32>
    %cst_13 = arith.constant dense<0.000000e+00> : vector<256x64xf32>
    %36 = tpu.matmul %34, %35, %cst_13 {dimension_numbers = #tpu.dot_dimension_numbers<[1], [0], [0], [1], [0, 0, 1, 1], [], []>} : vector<256x48xf32>, vector<48x64xf32>, vector<256x64xf32> -> vector<256x64xf32>
    %37 = arith.addf %28, %36 : vector<256x64xf32>
    %c0_14 = arith.constant 0 : index
    %c0_15 = arith.constant 0 : index
    %38 = vector.load %arg7[%c0_14, %c0_15] : memref<1x64xf32, #tpu.memory_space<vmem>>, vector<1x64xf32>
    %39 = vector.broadcast %38 : vector<1x64xf32> to vector<256x64xf32>
    %40 = arith.addf %37, %39 : vector<256x64xf32>
    %cst_16 = arith.constant 0.000000e+00 : f32
    %41 = vector.broadcast %cst_16 : f32 to vector<256x64xf32>
    %42 = arith.maximumf %40, %41 : vector<256x64xf32>
    %c0_17 = arith.constant 0 : index
    %c0_18 = arith.constant 0 : index
    %43 = vector.load %arg8[%c0_17, %c0_18] : memref<64x64xf32, #tpu.memory_space<vmem>>, vector<64x64xf32>
    %cst_19 = arith.constant dense<0.000000e+00> : vector<256x64xf32>
    %44 = tpu.matmul %42, %43, %cst_19 {dimension_numbers = #tpu.dot_dimension_numbers<[1], [0], [0], [1], [0, 0, 1, 1], [], []>} : vector<256x64xf32>, vector<64x64xf32>, vector<256x64xf32> -> vector<256x64xf32>
    %c0_20 = arith.constant 0 : index
    %c0_21 = arith.constant 0 : index
    %45 = vector.load %arg9[%c0_20, %c0_21] : memref<1x64xf32, #tpu.memory_space<vmem>>, vector<1x64xf32>
    %46 = vector.broadcast %45 : vector<1x64xf32> to vector<256x64xf32>
    %47 = arith.addf %44, %46 : vector<256x64xf32>
    %cst_22 = arith.constant 0.000000e+00 : f32
    %48 = vector.broadcast %cst_22 : f32 to vector<256x64xf32>
    %49 = arith.maximumf %47, %48 : vector<256x64xf32>
    %c0_23 = arith.constant 0 : index
    %c0_24 = arith.constant 0 : index
    %50 = vector.load %arg10[%c0_23, %c0_24] : memref<64x64xf32, #tpu.memory_space<vmem>>, vector<64x64xf32>
    %cst_25 = arith.constant dense<0.000000e+00> : vector<256x64xf32>
    %51 = tpu.matmul %49, %50, %cst_25 {dimension_numbers = #tpu.dot_dimension_numbers<[1], [0], [0], [1], [0, 0, 1, 1], [], []>} : vector<256x64xf32>, vector<64x64xf32>, vector<256x64xf32> -> vector<256x64xf32>
    %c0_26 = arith.constant 0 : index
    %c0_27 = arith.constant 0 : index
    %52 = vector.load %arg11[%c0_26, %c0_27] : memref<1x64xf32, #tpu.memory_space<vmem>>, vector<1x64xf32>
    %53 = vector.broadcast %52 : vector<1x64xf32> to vector<256x64xf32>
    %54 = arith.addf %51, %53 : vector<256x64xf32>
    %cst_28 = arith.constant 0.000000e+00 : f32
    %55 = vector.broadcast %cst_28 : f32 to vector<256x64xf32>
    %56 = arith.maximumf %54, %55 : vector<256x64xf32>
    %c0_29 = arith.constant 0 : index
    %c0_30 = arith.constant 0 : index
    %57 = vector.load %arg12[%c0_29, %c0_30] : memref<1x64xf32, #tpu.memory_space<vmem>>, vector<1x64xf32>
    %cst_31 = arith.constant dense<0.000000e+00> : vector<1x256xf32>
    %58 = tpu.matmul %57, %56, %cst_31 {dimension_numbers = #tpu.dot_dimension_numbers<[1], [1], [0], [0], [0, 0, 1, 0], [], []>} : vector<1x64xf32>, vector<256x64xf32>, vector<1x256xf32> -> vector<1x256xf32>
    %c0_32 = arith.constant 0 : index
    %c0_33 = arith.constant 0 : index
    %59 = vector.load %arg13[%c0_32, %c0_33] : memref<1x1xf32, #tpu.memory_space<vmem>>, vector<1x1xf32>
    %60 = vector.broadcast %59 : vector<1x1xf32> to vector<1x256xf32>
    %61 = arith.addf %58, %60 : vector<1x256xf32>
    %62 = arith.negf %61 : vector<1x256xf32>
    %63 = math.exp %62 : vector<1x256xf32>
    %cst_34 = arith.constant 1.000000e+00 : f32
    %64 = vector.broadcast %cst_34 : f32 to vector<1x256xf32>
    %65 = arith.addf %64, %63 : vector<1x256xf32>
    %66 = arith.divf %64, %65 : vector<1x256xf32>
    %c0_35 = arith.constant 0 : index
    %c0_36 = arith.constant 0 : index
    %c0_37 = arith.constant 0 : index
    %67 = vector.load %arg14[%c0_35, %c0_36, %c0_37] : memref<1x1x256xf32, #tpu.memory_space<vmem>>, vector<1x1x256xf32>
    %68 = vector.shape_cast %67 : vector<1x1x256xf32> to vector<1x256xf32>
    %69 = vector.shape_cast %66 : vector<1x256xf32> to vector<1x1x256xf32>
    tpu.vector_store %arg14[%c0_35, %c0_36, %c0_37], %69 {strides = array<i32>} : memref<1x1x256xf32, #tpu.memory_space<vmem>>, vector<1x1x256xf32>,
    return
  }
  func.func @transform_0(%arg0: i32) -> (i32, i32) {
    %c0_i32 = arith.constant 0 : i32
    %c0_i32_0 = arith.constant 0 : i32
    return %arg0, %c0_i32 : i32, i32
  }
  func.func @transform_1(%arg0: i32) -> (i32, i32) {
    %c0_i32 = arith.constant 0 : i32
    %c0_i32_0 = arith.constant 0 : i32
    return %arg0, %c0_i32 : i32, i32
  }
  func.func @transform_2(%arg0: i32) -> (i32, i32) {
    %c0_i32 = arith.constant 0 : i32
    %c0_i32_0 = arith.constant 0 : i32
    %c0_i32_1 = arith.constant 0 : i32
    return %c0_i32, %c0_i32_0 : i32, i32
  }
  func.func @transform_3(%arg0: i32) -> (i32, i32) {
    %c0_i32 = arith.constant 0 : i32
    %c0_i32_0 = arith.constant 0 : i32
    %c0_i32_1 = arith.constant 0 : i32
    return %c0_i32, %c0_i32_0 : i32, i32
  }
  func.func @transform_4(%arg0: i32) -> (i32, i32) {
    %c0_i32 = arith.constant 0 : i32
    %c0_i32_0 = arith.constant 0 : i32
    %c0_i32_1 = arith.constant 0 : i32
    return %c0_i32, %c0_i32_0 : i32, i32
  }
  func.func @transform_5(%arg0: i32) -> (i32, i32) {
    %c0_i32 = arith.constant 0 : i32
    %c0_i32_0 = arith.constant 0 : i32
    %c0_i32_1 = arith.constant 0 : i32
    return %c0_i32, %c0_i32_0 : i32, i32
  }
  func.func @transform_6(%arg0: i32) -> (i32, i32) {
    %c0_i32 = arith.constant 0 : i32
    %c0_i32_0 = arith.constant 0 : i32
    %c0_i32_1 = arith.constant 0 : i32
    return %c0_i32, %c0_i32_0 : i32, i32
  }
  func.func @transform_7(%arg0: i32) -> (i32, i32) {
    %c0_i32 = arith.constant 0 : i32
    %c0_i32_0 = arith.constant 0 : i32
    %c0_i32_1 = arith.constant 0 : i32
    return %c0_i32, %c0_i32_0 : i32, i32
  }
  func.func @transform_8(%arg0: i32) -> (i32, i32) {
    %c0_i32 = arith.constant 0 : i32
    %c0_i32_0 = arith.constant 0 : i32
    %c0_i32_1 = arith.constant 0 : i32
    return %c0_i32, %c0_i32_0 : i32, i32
  }
  func.func @transform_9(%arg0: i32) -> (i32, i32) {
    %c0_i32 = arith.constant 0 : i32
    %c0_i32_0 = arith.constant 0 : i32
    %c0_i32_1 = arith.constant 0 : i32
    return %c0_i32, %c0_i32_0 : i32, i32
  }
  func.func @transform_10(%arg0: i32) -> (i32, i32) {
    %c0_i32 = arith.constant 0 : i32
    %c0_i32_0 = arith.constant 0 : i32
    %c0_i32_1 = arith.constant 0 : i32
    return %c0_i32, %c0_i32_0 : i32, i32
  }
  func.func @transform_11(%arg0: i32) -> (i32, i32) {
    %c0_i32 = arith.constant 0 : i32
    %c0_i32_0 = arith.constant 0 : i32
    %c0_i32_1 = arith.constant 0 : i32
    return %c0_i32, %c0_i32_0 : i32, i32
  }
  func.func @transform_12(%arg0: i32) -> (i32, i32) {
    %c0_i32 = arith.constant 0 : i32
    %c0_i32_0 = arith.constant 0 : i32
    %c0_i32_1 = arith.constant 0 : i32
    return %c0_i32, %c0_i32_0 : i32, i32
  }
  func.func @transform_13(%arg0: i32) -> (i32, i32, i32) {
    %c0_i32 = arith.constant 0 : i32
    %c0_i32_0 = arith.constant 0 : i32
    %c0_i32_1 = arith.constant 0 : i32
    return %arg0, %c0_i32, %c0_i32_0 : i32, i32, i32
  }
}

</mosaic_0001>

<bundles_post_ra>
// kernel: discriminator_forward.1
= control target key start
LH: loop header
LB: loop body
LE: loop exit
PB: predicated region body
PF: predicated region fallthrough
CT: control target
= control target key end

     0   :  { %v3143_v0 = vmov 1   ;;  %v3144_v1 = vmov 0   ;;  %v3145_v16 = vmov 3   ;;  %vm842_vm0 = vcmask 1043456   ;;  %s4554_s1 = inlined_call_operand.vmem [shape: s32[256,4], index: 1, kind: input, shape index: {}]   ;;  %s4555_s2 = inlined_call_operand.vmem [shape: f32[48,64], index: 2, kind: input, shape index: {}]   ;;  %s4556_s3 = inlined_call_operand.vmem [shape: f32[4,64], index: 3, kind: input, shape index: {}]   ;;  %s4557_s5 = inlined_call_operand.vmem [shape: f32[48,64], index: 5, kind: input, shape index: {}]   ;;  %s4558_s4 = inlined_call_operand.vmem [shape: f32[48,64], index: 4, kind: input, shape index: {}]   ;;  %s4559_s6 = inlined_call_operand.vmem [shape: f32[1,64], index: 6, kind: input, shape index: {}]   ;;  %s4560_s7 = inlined_call_operand.vmem [shape: f32[64,64], index: 7, kind: input, shape index: {}]   ;;  %s4561_s0 = inlined_call_operand.vmem [shape: f32[256,64], index: 0, kind: input, shape index: {}]   ;;  %s4562_s8 = inlined_call_operand.vmem [shape: f32[1,64], index: 8, kind: input, shape index: {}]   ;;  %s4563_s9 = inlined_call_operand.vmem [shape: f32[64,64], index: 9, kind: input, shape index: {}]   ;;  %s4564_s10 = inlined_call_operand.vmem [shape: f32[1,64], index: 10, kind: input, shape index: {}]   ;;  %s4565_s11 = inlined_call_operand.vmem [shape: f32[1,64], index: 11, kind: input, shape index: {}]   ;;  %s4566_s12 = inlined_call_operand.<no memory space> [shape: f32[1,1], index: 12, kind: input, shape index: {}]   ;;  %s4567_s13 = inlined_call_operand.vmem [shape: f32[1,1,256], index: 13, kind: output, shape index: {}]  }
   0x1   :  { %3014 = vset.pattern.permute.xlu1 %v3143_v0  ;;  %3013 = vset.pattern.permute.xlu0 %v3144_v1  ;;  %v3223_v2 = vld [vmem:[%s4554_s1 + $0x90] sm:$0xff]  ;;  %v63_v3 = vld [vmem:[%s4554_s1 + $0x88] sm:$0xff]  ;;  %v65_v4 = vld [vmem:[%s4554_s1 + $0x98] sm:$0xff]  ;;  %v3146_v29 = vmov 2   ;;  %v110_v33 = vlaneseq  ;;  %vm310_vm1 = vcmask 392192   ;;  %vm745_vm2 = vcmask 31744  }
   0x2   :  { %607 = vperm.xlu1 %3014, %v3223_v2   ;;  %164 = vperm.xlu0 %3013, %v63_v3   ;;  %v3238_v5 = vld [vmem:[%s4554_s1 + $0xa0] sm:$0xff]  ;;  %v67_v6 = vld [vmem:[%s4554_s1 + $0xa8] sm:$0xff]  ;;  %v3251_v7 = vld [vmem:[%s4554_s1 + $0xb0] sm:$0xff]  ;;  %v3147_v39 = vmov 0.0  }
   0x3   :  { %3016 = vset.pattern.permute.xlu2 %v3143_v0  ;;  %v69_v8 = vld [vmem:[%s4554_s1 + $0xb8] sm:$0xff]  ;;  %v71_v9 = vld [vmem:[%s4554_s1 + $0xc8] sm:$0xff]  ;;  %v70_v10 = vld [vmem:[%s4554_s1 + $0xc0] sm:$0xff]  ;;  %v3358_v35 = vand.u32 127, %v110_v33 }
   0x4   :  { %610 = vperm.xlu2 %3016, %v65_v4   ;;  %v74_v11 = vld [vmem:[%s4554_s1 + $0xe0] sm:$0xff]  ;;  %v72_v12 = vld [vmem:[%s4554_s1 + $0xd0] sm:$0xff]  ;;  %v73_v14 = vld [vmem:[%s4554_s1 + $0xd8] sm:$0xff] }
   0x5   :  { %v3278_v13 = vld [vmem:[%s4554_s1] sm:$0xff]  ;;  %v3289_v15 = vld [vmem:[%s4554_s1 + $0x8] sm:$0xff]  ;;  %v3296_v17 = vld [vmem:[%s4554_s1 + $0x30] sm:$0xff] }
   0x6   :  { %v75_v18 = vld [vmem:[%s4554_s1 + $0xe8] sm:$0xff]  ;;  %v308_v20 = vld [vmem:[%s4555_s2 + $0x20] sm:$0xff]  ;;  %v307_v21 = vld [vmem:[%s4555_s2 + $0x18] sm:$0xff] }
   0x7   :  { %v309_v19 = vld [vmem:[%s4555_s2 + $0x28] sm:$0xff]  ;;  %v76_v22 = vld [vmem:[%s4554_s1 + $0xf0] sm:$0xff]  ;;  %v77_v25 = vld [vmem:[%s4554_s1 + $0xf8] sm:$0xff] }
   0x8   :  { %3001 = vmatpush.msra.mxu2 %v309_v19  ;;  %417 = vmatpush.msra.mxu0 %v309_v19  ;;  %v306_v23 = vld [vmem:[%s4555_s2 + $0x10] sm:$0xff]  ;;  %v305_v24 = vld [vmem:[%s4555_s2 + $0x8] sm:$0xff]  ;;  %v304_v26 = vld [vmem:[%s4555_s2] sm:$0xff] }
   0x9   :  { %v744_v27 = vld [vmem:[%s4556_s3] sm:$0xf]  ;;  %v3341_v30 = vld [vmem:[%s4554_s1 + $0x18] sm:$0xff]  ;;  %v48_v42 = vld [vmem:[%s4554_s1 + $0x10] sm:$0xff] }
   0xa   :  { %3015 = vset.pattern.permute.xlu1 %v3144_v1  ;;  %167 = vperm.xlu0 %3013, %v3223_v2   ;;  %v3353_v32 = vld [vmem:[%s4554_s1 + $0x40] sm:$0xff]  ;;  %v3386_v46 = vld [vmem:[%s4554_s1 + $0x48] sm:$0xff] }
   0xb   :  { %170 = vperm.xlu1 %3015, %v65_v4   ;;  %3002 = vmatpush.msra.mxu2 %v308_v20  ;;  %v3369_v38 = vld [vmem:[%s4554_s1 + $0x20] sm:$0xff]  ;;  %v3404_v53 = vld [vmem:[%s4554_s1 + $0x28] sm:$0xff] }
   0xc   :  { %3017 = vset.pattern.permute.xlu2 %v3144_v1  ;;  %418 = vmatpush.msra.mxu0 %v308_v20 }
   0xd   :  { %173 = vperm.xlu2 %3017, %v3238_v5   ;;  %3003 = vmatpush.msra.mxu2 %v307_v21 }
   0xe   :  { %419 = vmatpush.msra.mxu0 %v307_v21  ;;  %3007 = vmatpush.msk.msra.mxu3 %vm842_vm0, %v744_v27 }
   0xf   :  { %3004 = vmatpush.msra.mxu2 %v306_v23  ;;  %2740 = vmatpush.msk.msra.mxu1 %vm842_vm0, %v744_v27 }
  0x10   :  { %420 = vmatpush.msra.mxu0 %v306_v23 }
  0x11   :  { %3005 = vmatpush.msra.mxu2 %v305_v24 }
  0x12   :  { %3018 = vset.pattern.permute.xlu0 %v3143_v0  ;;  %421 = vmatpush.msra.mxu0 %v305_v24 }
  0x13   :  { %176 = vperm.xlu1 %3015, %v67_v6   ;;  %613 = vperm.xlu0 %3018, %v3238_v5  }
  0x14   :  { %3006 = vmatpush.msra.mxu2 %v304_v26  ;;  %422 = vmatpush.msra.mxu0 %v304_v26 }
  0x15   :  { %3019 = vset.pattern.permute.xlu2 %v3143_v0 }
  0x16   :  { %616 = vperm.xlu2 %3019, %v67_v6  }
  0x1b   :  { %179 = vperm.xlu1 %3015, %v3251_v7   ;;  %3020 = vset.pattern.permute.xlu0 %v3144_v1 }
  0x1c   :  { %182 = vperm.xlu0 %3020, %v69_v8  }
  0x1e   :  { %619 = vperm.xlu2 %3019, %v3251_v7  }
  0x23   :  { %3021 = vset.pattern.permute.xlu1 %v3143_v0 }
  0x24   :  { %622 = vperm.xlu1 %3021, %v69_v8   ;;  %3023 = vset.pattern.permute.xlu0 %v3143_v0 }
  0x25   :  { %628 = vperm.xlu0 %3023, %v71_v9  }
  0x26   :  { %3022 = vset.pattern.permute.xlu2 %v3144_v1 }
  0x27   :  { %185 = vperm.xlu2 %3022, %v70_v10  }
  0x2c   :  { %625 = vperm.xlu1 %3021, %v70_v10  }
  0x2d   :  { %3026 = vset.pattern.permute.xlu0 %v3144_v1 }
  0x2e   :  { %197 = vperm.xlu0 %3026, %v74_v11  }
  0x2f   :  { %188 = vperm.xlu2 %3022, %v71_v9  }
  0x34   :  { %3024 = vset.pattern.permute.xlu1 %v3144_v1 }
  0x35   :  { %191 = vperm.xlu1 %3024, %v72_v12  }
  0x36   :  { %113 = vperm.xlu0 %3026, %v3278_v13  }
  0x37   :  { %3025 = vset.pattern.permute.xlu2 %v3143_v0 }
  0x38   :  { %631 = vperm.xlu2 %3025, %v72_v12  }
  0x3d   :  { %194 = vperm.xlu1 %3024, %v73_v14  }
  0x3e   :  { %3037 = vset.pattern.permute.xlu0 %v3145_v16 }
  0x3f   :  { %1434 = vperm.xlu0 %3037, %v3289_v15  }
  0x40   :  { %634 = vperm.xlu2 %3025, %v73_v14  }
  0x45   :  { %3027 = vset.pattern.permute.xlu1 %v3143_v0 }
  0x46   :  { %637 = vperm.xlu1 %3027, %v74_v11  }
  0x47   :  { %1449 = vperm.xlu0 %3037, %v3296_v17  }
  0x48   :  { %3028 = vset.pattern.permute.xlu2 %v3144_v1 }
  0x49   :  { %200 = vperm.xlu2 %3028, %v75_v18  }
  0x4e   :  { %640 = vperm.xlu1 %3027, %v75_v18  }
  0x4f   :  { %3054 = vset.pattern.permute.xlu0 %v3143_v0 }
  0x50   :  { %643 = vperm.xlu0 %3054, %v76_v22  }
  0x51   :  { %203 = vperm.xlu2 %3028, %v76_v22  }
  0x56   :  { %3029 = vset.pattern.permute.xlu1 %v3144_v1 }
  0x57   :  { %206 = vperm.xlu1 %3029, %v77_v25  }
  0x58   :  { %562 = vperm.xlu0 %3054, %v3341_v30  }
  0x59   :  { %3030 = vset.pattern.permute.xlu2 %v3143_v0 }
  0x5a   :  { %646 = vperm.xlu2 %3030, %v77_v25  }
  0x5e   :  { %v611_v28 = vpop.permute.xlu2 %610 }
  0x5f   :  { %3031 = vset.pattern.permute.xlu1 %v3143_v0  ;;  %vm667_vm5 = vcmp.eq.s32.totalorder %v3358_v35, %v611_v28  ;;  %v1627_v28 = vld [vmem:[%s4557_s5 + $0x28] sm:$0xff] }
  0x60   :  { %553 = vperm.xlu1 %3031, %v3278_v13   ;;  %577 = vperm.xlu0 %3054, %v3353_v32   ;;  %v2727_v48 = vsel %vm667_vm5, 1.0, %v3147_v39 }
  0x61   :  { %1734 = vmatpush.msrb.mxu3 %v1627_v28 }
  0x62   :  { %3032 = vset.pattern.permute.xlu2 %v3146_v29 }
  0x63   :  { %992 = vperm.xlu2 %3032, %v3278_v13  }
  0x67   :  { %v3344_v31 = vpop.permute.xlu2 %173 }
  0x68   :  { %3033 = vset.pattern.permute.xlu1 %v3145_v16  ;;  %3059 = vset.pattern.permute.xlu0 %v3146_v29  ;;  %vm228_vm10 = vcmp.eq.s32.totalorder %v3358_v35, %v3344_v31 }
  0x69   :  { %1431 = vperm.xlu1 %3033, %v3278_v13   ;;  %1004 = vperm.xlu0 %3059, %v3369_v38   ;;  %v2664_v58 = vsel %vm228_vm10, 1.0, %v3147_v39 }
  0x6b   :  { %3034 = vset.pattern.permute.xlu2 %v3143_v0 }
  0x6c   :  { %556 = vperm.xlu2 %3034, %v3289_v15  }
  0x70   :  { %v617_v34 = vpop.permute.xlu2 %616 }
  0x71   :  { %3035 = vset.pattern.permute.xlu1 %v3146_v29  ;;  %1019 = vperm.xlu0 %3059, %v3386_v46   ;;  %vm669_vm9 = vcmp.eq.s32.totalorder %v3358_v35, %v617_v34  ;;  %v1626_v34 = vld [vmem:[%s4557_s5 + $0x20] sm:$0xff] }
  0x72   :  { %995 = vperm.xlu1 %3035, %v3289_v15   ;;  %v2729_v56 = vsel %vm669_vm9, 1.0, %v3147_v39  ;;  %1735 = vmatpush.msrb.mxu3 %v1626_v34 }
  0x74   :  { %v608_v36 = vpop.permute.xlu1 %607  ;;  %v165_v37 = vpop.permute.xlu0 %164  ;;  %3036 = vset.pattern.permute.xlu2 %v3144_v1 }
  0x75   :  { %vm666_vm3 = vcmp.eq.s32.totalorder %v3358_v35, %v608_v36  ;;  %vm225_vm4 = vcmp.eq.s32.totalorder %v3358_v35, %v165_v37  ;;  %116 = vperm.xlu2 %3036, %v3289_v15   ;;  %v53_v37 = vld [vmem:[%s4554_s1 + $0x38] sm:$0xff] }
  0x76   :  { %v2661_v40 = vsel %vm225_vm4, 1.0, %v3147_v39  ;;  %v2726_v41 = vsel %vm666_vm3, 1.0, %v3147_v39 }
  0x77   :  { %2693 = vmatmul.msk.f32.vlgmr.msra.gmra.mxu2 %vm310_vm1, %v2661_v40  ;;  %2759 = vmatmul.msk.f32.vlgmr.msra.gmra.mxu3 %vm745_vm2, %v2726_v41  ;;  %v1624_v40 = vld [vmem:[%s4557_s5 + $0x10] sm:$0xff]  ;;  %v1188_v41 = vld [vmem:[%s4558_s4 + $0x28] sm:$0xff] }
  0x78   :  { %v620_v43 = vpop.permute.xlu2 %619  ;;  %1295 = vmatpush.msrb.mxu2 %v1188_v41 }
  0x79   :  { %3064 = vset.pattern.permute.xlu0 %v3144_v1  ;;  %vm670_vm12 = vcmp.eq.s32.totalorder %v3358_v35, %v620_v43 }
  0x7a   :  { %3038 = vset.pattern.permute.xlu1 %v3143_v0  ;;  %128 = vperm.xlu0 %3064, %v3404_v53   ;;  %v2730_v63 = vsel %vm670_vm12, 1.0, %v3147_v39 }
  0x7b   :  { %559 = vperm.xlu1 %3038, %v48_v42  }
  0x7c   :  { %v168_v44 = vpop.permute.xlu0 %167 }
  0x7d   :  { %vm226_vm6 = vcmp.eq.s32.totalorder %v3358_v35, %v168_v44  ;;  %v171_v45 = vpop.permute.xlu1 %170  ;;  %3039 = vset.pattern.permute.xlu2 %v3146_v29  ;;  %v1187_v44 = vld [vmem:[%s4558_s4 + $0x20] sm:$0xff] }
  0x7e   :  { %v2662_v47 = vsel %vm226_vm6, 1.0, %v3147_v39  ;;  %998 = vperm.xlu2 %3039, %v48_v42   ;;  %vm227_vm7 = vcmp.eq.s32.totalorder %v3358_v35, %v171_v45  ;;  %1296 = vmatpush.msrb.mxu2 %v1187_v44  ;;  %v58_v44 = vld [vmem:[%s4554_s1 + $0x60] sm:$0xff] }
  0x7f   :  { %2694 = vmatmul.msk.f32.gmra.mxu2 %vm310_vm1, %v2662_v47  ;;  %2760 = vmatmul.msk.f32.gmra.mxu3 %vm745_vm2, %v2727_v48  ;;  %v2663_v52 = vsel %vm227_vm7, 1.0, %v3147_v39  ;;  %v1622_v48 = vld [vmem:[%s4557_s5] sm:$0xff] }
  0x81   :  { %v3393_v49 = vpop.permute.xlu2 %185 }
  0x82   :  { %vm232_vm5 = vcmp.eq.s32.totalorder %v3358_v35, %v3393_v49 }
  0x83   :  { %3040 = vset.pattern.permute.xlu1 %v3144_v1  ;;  %v2668_v21 = vsel %vm232_vm5, 1.0, %v3147_v39 }
  0x84   :  { %119 = vperm.xlu1 %3040, %v48_v42  }
  0x85   :  { %v177_v50 = vpop.permute.xlu1 %176  ;;  %v614_v51 = vpop.permute.xlu0 %613 }
  0x86   :  { %vm668_vm8 = vcmp.eq.s32.totalorder %v3358_v35, %v614_v51  ;;  %3041 = vset.pattern.permute.xlu2 %v3145_v16  ;;  %vm229_vm11 = vcmp.eq.s32.totalorder %v3358_v35, %v177_v50  ;;  %v1186_v50 = vld [vmem:[%s4558_s4 + $0x18] sm:$0xff]  ;;  %v1185_v51 = vld [vmem:[%s4558_s4 + $0x10] sm:$0xff] }
  0x87   :  { %v2728_v54 = vsel %vm668_vm8, 1.0, %v3147_v39  ;;  %2695 = vmatmul.msk.f32.gmra.mxu2 %vm310_vm1, %v2663_v52  ;;  %1437 = vperm.xlu2 %3041, %v48_v42   ;;  %v2665_v61 = vsel %vm229_vm11, 1.0, %v3147_v39  ;;  %v1623_v42 = vld [vmem:[%s4557_s5 + $0x8] sm:$0xff] }
  0x88   :  { %2761 = vmatmul.msk.f32.gmra.mxu3 %vm745_vm2, %v2728_v54  ;;  %1297 = vmatpush.msrb.mxu2 %v1186_v50 }
  0x89   :  { %v3410_v55 = vpop.permute.xlu2 %188 }
  0x8a   :  { %vm233_vm6 = vcmp.eq.s32.totalorder %v3358_v35, %v3410_v55  ;;  %1298 = vmatpush.msrb.mxu2 %v1185_v51  ;;  %v1183_v55 = vld [vmem:[%s4558_s4] sm:$0xff] }
  0x8b   :  { %v2669_v24 = vsel %vm233_vm6, 1.0, %v3147_v39 }
  0x8c   :  { %3042 = vset.pattern.permute.xlu1 %v3146_v29 }
  0x8d   :  { %v180_v57 = vpop.permute.xlu1 %179  ;;  %1001 = vperm.xlu1 %3042, %v3341_v30  }
  0x8e   :  { %v183_v59 = vpop.permute.xlu0 %182  ;;  %vm230_vm13 = vcmp.eq.s32.totalorder %v3358_v35, %v180_v57 }
  0x8f   :  { %2696 = vmatmul.msk.f32.gmra.mxu2 %vm310_vm1, %v2664_v58  ;;  %3043 = vset.pattern.permute.xlu2 %v3144_v1  ;;  %v2666_v6 = vsel %vm230_vm13, 1.0, %v3147_v39  ;;  %vm231_vm15 = vcmp.eq.s32.totalorder %v3358_v35, %v183_v59 }
  0x90   :  { %2762 = vmatmul.msk.f32.gmra.mxu3 %vm745_vm2, %v2729_v56  ;;  %122 = vperm.xlu2 %3043, %v3341_v30   ;;  %v2667_v12 = vsel %vm231_vm15, 1.0, %v3147_v39  ;;  %v3557_v56 = vld [vmem:[%s4554_s1 + $0x50] sm:$0xff] }
  0x91   :  { %143 = vperm.xlu0 %3064, %v3557_v56  }
  0x92   :  { %v632_v60 = vpop.permute.xlu2 %631 }
  0x93   :  { %vm674_vm7 = vcmp.eq.s32.totalorder %v3358_v35, %v632_v60 }
  0x94   :  { %v2734_v25 = vsel %vm674_vm7, 1.0, %v3147_v39 }
  0x95   :  { %3044 = vset.pattern.permute.xlu1 %v3145_v16 }
  0x96   :  { %v623_v62 = vpop.permute.xlu1 %622  ;;  %1440 = vperm.xlu1 %3044, %v3341_v30  }
  0x97   :  { %2697 = vmatmul.msk.f32.gmra.mxu2 %vm310_vm1, %v2665_v61  ;;  %v629_v3 = vpop.permute.xlu0 %628  ;;  %vm671_vm14 = vcmp.eq.s32.totalorder %v3358_v35, %v623_v62 }
  0x98   :  { %2763 = vmatmul.msk.f32.gmra.mxu3 %vm745_vm2, %v2730_v63  ;;  %3045 = vset.pattern.permute.xlu2 %v3143_v0  ;;  %v2731_v9 = vsel %vm671_vm14, 1.0, %v3147_v39  ;;  %vm673_vm4 = vcmp.eq.s32.totalorder %v3358_v35, %v629_v3 }
  0x99   :  { %565 = vperm.xlu2 %3045, %v3369_v38   ;;  %v2733_v20 = vsel %vm673_vm4, 1.0, %v3147_v39  ;;  %3073 = vset.pattern.permute.xlu0 %v3145_v16 }
  0x9a   :  { %v3433_v4 = vpop.permute.xlu2 %634 }
  0x9b   :  { %vm675_vm9 = vcmp.eq.s32.totalorder %v3358_v35, %v3433_v4 }
  0x9c   :  { %v2735_v36 = vsel %vm675_vm9, 1.0, %v3147_v39 }
  0x9e   :  { %v626_v8 = vpop.permute.xlu1 %625  ;;  %3046 = vset.pattern.permute.xlu1 %v3144_v1 }
  0x9f   :  { %2698 = vmatmul.msk.f32.gmra.mxu2 %vm310_vm1, %v2666_v6  ;;  %125 = vperm.xlu1 %3046, %v3369_v38   ;;  %vm672_vm0 = vcmp.eq.s32.totalorder %v3358_v35, %v626_v8 }
  0xa0   :  { %2764 = vmatmul.msk.f32.gmra.mxu3 %vm745_vm2, %v2731_v9  ;;  %v3443_v10 = vpop.permute.xlu0 %197  ;;  %v2732_v13 = vsel %vm672_vm0, 1.0, %v3147_v39 }
  0xa1   :  { %3047 = vset.pattern.permute.xlu2 %v3145_v16  ;;  %vm236_vm12 = vcmp.eq.s32.totalorder %v3358_v35, %v3443_v10 }
  0xa2   :  { %1443 = vperm.xlu2 %3047, %v3369_v38   ;;  %v2672_v54 = vsel %vm236_vm12, 1.0, %v3147_v39 }
  0xa3   :  { %v3448_v11 = vpop.permute.xlu2 %200 }
  0xa4   :  { %vm237_vm0 = vcmp.eq.s32.totalorder %v3358_v35, %v3448_v11 }
  0xa5   :  { %v2673_v3 = vsel %vm237_vm0, 1.0, %v3147_v39 }
  0xa7   :  { %v192_v14 = vpop.permute.xlu1 %191  ;;  %2699 = vmatmul.msk.f32.gmra.mxu2 %vm310_vm1, %v2667_v12  ;;  %3048 = vset.pattern.permute.xlu1 %v3143_v0  ;;  %v3601_v12 = vld [vmem:[%s4554_s1 + $0x58] sm:$0xff] }
  0xa8   :  { %2765 = vmatmul.msk.f32.gmra.mxu3 %vm745_vm2, %v2732_v13  ;;  %568 = vperm.xlu1 %3048, %v3404_v53   ;;  %v114_v15 = vpop.permute.xlu0 %113  ;;  %vm234_vm8 = vcmp.eq.s32.totalorder %v3358_v35, %v192_v14 }
  0xa9   :  { %vm208_vm3 = vcmp.eq.s32.totalorder %v3358_v35, %v114_v15  ;;  %v2670_v31 = vsel %vm234_vm8, 1.0, %v3147_v39  ;;  %1464 = vperm.xlu0 %3073, %v3601_v12  }
  0xaa   :  { %3049 = vset.pattern.permute.xlu2 %v3146_v29  ;;  %v2644_v18 = vsel %vm208_vm3, 1.0, %v3147_v39 }
  0xab   :  { %1007 = vperm.xlu2 %3049, %v3404_v53   ;;  %v3464_v19 = vpop.permute.xlu2 %203  ;;  %2676 = vmatmul.msk.f32.vlgmr.msra.gmra.mxu0 %vm310_vm1, %v2644_v18 }
  0xac   :  { %vm238_vm5 = vcmp.eq.s32.totalorder %v3358_v35, %v3464_v19 }
  0xad   :  { %v2674_v9 = vsel %vm238_vm5, 1.0, %v3147_v39 }
  0xaf   :  { %v195_v22 = vpop.permute.xlu1 %194  ;;  %2700 = vmatmul.msk.f32.gmra.mxu2 %vm310_vm1, %v2668_v21 }
  0xb0   :  { %2766 = vmatmul.msk.f32.gmra.mxu3 %vm745_vm2, %v2733_v20  ;;  %3050 = vset.pattern.permute.xlu1 %v3145_v16  ;;  %vm235_vm10 = vcmp.eq.s32.totalorder %v3358_v35, %v195_v22 }
  0xb1   :  { %1446 = vperm.xlu1 %3050, %v3404_v53   ;;  %v3487_v27 = vpop.permute.xlu0 %1434  ;;  %v2671_v45 = vsel %vm235_vm10, 1.0, %v3147_v39  ;;  %v1184_v53 = vld [vmem:[%s4558_s4 + $0x8] sm:$0xff]  ;;  %3078 = vset.pattern.permute.xlu0 %v3143_v0 }
  0xb2   :  { %1299 = vmatpush.msrb.mxu2 %v1184_v53  ;;  %vm1527_vm9 = vcmp.eq.s32.totalorder %v3358_v35, %v3487_v27 }
  0xb3   :  { %3051 = vset.pattern.permute.xlu2 %v3143_v0  ;;  %v2838_v20 = vsel %vm1527_vm9, 1.0, %v3147_v39 }
  0xb4   :  { %571 = vperm.xlu2 %3051, %v3296_v17   ;;  %v3478_v23 = vpop.permute.xlu2 %646  ;;  %1300 = vmatpush.msrb.mxu2 %v1183_v55 }
  0xb5   :  { %vm679_vm6 = vcmp.eq.s32.totalorder %v3358_v35, %v3478_v23 }
  0xb6   :  { %v2739_v10 = vsel %vm679_vm6, 1.0, %v3147_v39 }
  0xb7   :  { %2701 = vmatmul.msk.f32.gmra.mxu2 %vm310_vm1, %v2669_v24 }
  0xb8   :  { %v638_v26 = vpop.permute.xlu1 %637  ;;  %2767 = vmatmul.msk.f32.gmra.mxu3 %vm745_vm2, %v2734_v25 }
  0xb9   :  { %3052 = vset.pattern.permute.xlu1 %v3146_v29  ;;  %vm676_vm11 = vcmp.eq.s32.totalorder %v3358_v35, %v638_v26  ;;  %v3523_v43 = vpop.permute.xlu0 %1449 }
  0xba   :  { %1010 = vperm.xlu1 %3052, %v3296_v17   ;;  %v2736_v49 = vsel %vm676_vm11, 1.0, %v3147_v39 }
  0xbc   :  { %3053 = vset.pattern.permute.xlu2 %v3144_v1 }
  0xbd   :  { %131 = vperm.xlu2 %3053, %v3296_v17   ;;  %v3496_v30 = vpop.permute.xlu2 %992  ;;  %v1625_v17 = vld [vmem:[%s4557_s5 + $0x18] sm:$0xff] }
  0xbe   :  { %1736 = vmatpush.msrb.mxu3 %v1625_v17  ;;  %vm1087_vm10 = vcmp.eq.s32.totalorder %v3358_v35, %v3496_v30 }
  0xbf   :  { %2702 = vmatmul.msk.f32.gmra.mxu2 %vm310_vm1, %v2670_v31  ;;  %v2773_v21 = vsel %vm1087_vm10, 1.0, %v3147_v39  ;;  %v3655_v31 = vld [vmem:[%s4554_s1 + $0x68] sm:$0xff] }
  0xc0   :  { %v641_v38 = vpop.permute.xlu1 %640  ;;  %2768 = vmatmul.msk.f32.gmra.mxu3 %vm745_vm2, %v2735_v36  ;;  %592 = vperm.xlu0 %3078, %v3655_v31  }
  0xc1   :  { %1737 = vmatpush.msrb.mxu3 %v1624_v40  ;;  %vm677_vm13 = vcmp.eq.s32.totalorder %v3358_v35, %v641_v38 }
  0xc2   :  { %3055 = vset.pattern.permute.xlu1 %v3143_v0  ;;  %v2737_v57 = vsel %vm677_vm13, 1.0, %v3147_v39  ;;  %v644_v58 = vpop.permute.xlu0 %643 }
  0xc3   :  { %574 = vperm.xlu1 %3055, %v53_v37   ;;  %1738 = vmatpush.msrb.mxu3 %v1623_v42  ;;  %vm678_vm15 = vcmp.eq.s32.totalorder %v3358_v35, %v644_v58 }
  0xc4   :  { %v2738_v63 = vsel %vm678_vm15, 1.0, %v3147_v39 }
  0xc5   :  { %3056 = vset.pattern.permute.xlu2 %v3146_v29  ;;  %1739 = vmatpush.msrb.mxu3 %v1622_v48 }
  0xc6   :  { %1013 = vperm.xlu2 %3056, %v53_v37   ;;  %v557_v47 = vpop.permute.xlu2 %556 }
  0xc7   :  { %2703 = vmatmul.msk.f32.gmra.mxu2 %vm310_vm1, %v2671_v45  ;;  %vm649_vm4 = vcmp.eq.s32.totalorder %v3358_v35, %v557_v47 }
  0xc8   :  { %2769 = vmatmul.msk.f32.gmra.mxu3 %vm745_vm2, %v2736_v49  ;;  %v2709_v6 = vsel %vm649_vm4, 1.0, %v3147_v39  ;;  %3083 = vset.pattern.permute.xlu0 %v3146_v29  ;;  %v3686_v49 = vld [vmem:[%s4554_s1 + $0x70] sm:$0xff] }
  0xc9   :  { %v207_v52 = vpop.permute.xlu1 %206  ;;  %1034 = vperm.xlu0 %3083, %v3686_v49  }
  0xca   :  { %vm239_vm7 = vcmp.eq.s32.totalorder %v3358_v35, %v207_v52  ;;  %v563_v18 = vpop.permute.xlu0 %562 }
  0xcb   :  { %3057 = vset.pattern.permute.xlu1 %v3144_v1  ;;  %v2675_v13 = vsel %vm239_vm7, 1.0, %v3147_v39  ;;  %vm651_vm12 = vcmp.eq.s32.totalorder %v3358_v35, %v563_v18 }
  0xcc   :  { %134 = vperm.xlu1 %3057, %v53_v37   ;;  %v2711_v23 = vsel %vm651_vm12, 1.0, %v3147_v39 }
  0xce   :  { %3058 = vset.pattern.permute.xlu2 %v3145_v16 }
  0xcf   :  { %2704 = vmatmul.msk.f32.gmra.mxu2 %vm310_vm1, %v2672_v54  ;;  %1452 = vperm.xlu2 %3058, %v53_v37   ;;  %v117_v59 = vpop.permute.xlu2 %116 }
  0xd0   :  { %2770 = vmatmul.msk.f32.gmra.mxu3 %vm745_vm2, %v2737_v57  ;;  %vm209_vm14 = vcmp.eq.s32.totalorder %v3358_v35, %v117_v59 }
  0xd1   :  { %v2645_v60 = vsel %vm209_vm14, 1.0, %v3147_v39  ;;  %3088 = vset.pattern.permute.xlu0 %v3144_v1 }
  0xd2   :  { %v554_v61 = vpop.permute.xlu1 %553  ;;  %2677 = vmatmul.msk.f32.gmra.mxu0 %vm310_vm1, %v2645_v60  ;;  %v3634_v24 = vpop.permute.xlu0 %577 }
  0xd3   :  { %vm648_vm3 = vcmp.eq.s32.totalorder %v3358_v35, %v554_v61 }
  0xd4   :  { %v2708_v62 = vsel %vm648_vm3, 1.0, %v3147_v39  ;;  %3060 = vset.pattern.permute.xlu1 %v3146_v29 }
  0xd5   :  { %1016 = vperm.xlu1 %3060, %v3353_v32   ;;  %2741 = vmatmul.msk.f32.vlgmr.msra.gmra.mxu1 %vm745_vm2, %v2708_v62 }
  0xd7   :  { %2705 = vmatmul.msk.f32.gmra.mxu2 %vm310_vm1, %v2673_v3  ;;  %3061 = vset.pattern.permute.xlu2 %v3144_v1 }
  0xd8   :  { %2771 = vmatmul.msk.f32.gmra.mxu3 %vm745_vm2, %v2738_v63  ;;  %137 = vperm.xlu2 %3061, %v3353_v32   ;;  %v3581_v4 = vpop.permute.xlu2 %998 }
  0xd9   :  { %vm1089_vm3 = vcmp.eq.s32.totalorder %v3358_v35, %v3581_v4 }
  0xda   :  { %v2775_v36 = vsel %vm1089_vm3, 1.0, %v3147_v39 }
  0xdb   :  { %v1432_v8 = vpop.permute.xlu1 %1431  ;;  %v1005_v17 = vpop.permute.xlu0 %1004 }
  0xdc   :  { %vm1526_vm8 = vcmp.eq.s32.totalorder %v3358_v35, %v1432_v8  ;;  %vm1091_vm7 = vcmp.eq.s32.totalorder %v3358_v35, %v1005_v17 }
  0xdd   :  { %3062 = vset.pattern.permute.xlu1 %v3145_v16  ;;  %2742 = vmatmul.msk.f32.gmra.mxu1 %vm745_vm2, %v2709_v6  ;;  %v2837_v14 = vsel %vm1526_vm8, 1.0, %v3147_v39  ;;  %v2777_v48 = vsel %vm1091_vm7, 1.0, %v3147_v39  ;;  %vm656_vm7 = vcmp.eq.s32.totalorder %v3358_v35, %v3634_v24 }
  0xde   :  { %1455 = vperm.xlu1 %3062, %v3353_v32  }
  0xdf   :  { %2706 = vmatmul.msk.f32.gmra.mxu2 %vm310_vm1, %v2674_v9 }
  0xe0   :  { %2772 = vmatmul.msk.f32.gmra.mxu3 %vm745_vm2, %v2739_v10  ;;  %3063 = vset.pattern.permute.xlu2 %v3143_v0  ;;  %v3740_v10 = vld [vmem:[%s4554_s1 + $0x80] sm:$0xff] }
  0xe1   :  { %580 = vperm.xlu2 %3063, %v3386_v46   ;;  %v1438_v11 = vpop.permute.xlu2 %1437 }
  0xe2   :  { %vm1528_vm14 = vcmp.eq.s32.totalorder %v3358_v35, %v1438_v11 }
  0xe3   :  { %v2839_v27 = vsel %vm1528_vm14, 1.0, %v3147_v39  ;;  %v3677_v45 = vpop.permute.xlu0 %1019 }
  0xe4   :  { %v996_v32 = vpop.permute.xlu1 %995 }
  0xe5   :  { %vm1088_vm13 = vcmp.eq.s32.totalorder %v3358_v35, %v996_v32 }
  0xe6   :  { %3065 = vset.pattern.permute.xlu1 %v3144_v1  ;;  %v2774_v25 = vsel %vm1088_vm13, 1.0, %v3147_v39 }
  0xe7   :  { %2707 = vmatmul.msk.f32.gmra.mxu2 %vm310_vm1, %v2675_v13  ;;  %140 = vperm.xlu1 %3065, %v3386_v46  }
  0xe8   :  { %2869 = vmatmul.msk.f32.vlgmr.msrb.gmra.mxu3 %vm310_vm1, %v2837_v14 }
  0xe9   :  { %3066 = vset.pattern.permute.xlu2 %v3145_v16 }
  0xea   :  { %1458 = vperm.xlu2 %3066, %v3386_v46   ;;  %v123_v15 = vpop.permute.xlu2 %122 }
  0xeb   :  { %vm211_vm4 = vcmp.eq.s32.totalorder %v3358_v35, %v123_v15 }
  0xec   :  { %v2647_v37 = vsel %vm211_vm4, 1.0, %v3147_v39  ;;  %v129_v54 = vpop.permute.xlu0 %128 }
  0xed   :  { %v560_v19 = vpop.permute.xlu1 %559 }
  0xee   :  { %vm650_vm11 = vcmp.eq.s32.totalorder %v3358_v35, %v560_v19 }
  0xef   :  { %v2710_v22 = vsel %vm650_vm11, 1.0, %v3147_v39  ;;  %2805 = vmatmul.msk.f32.vlgmr.msrb.gmra.mxu2 %vm310_vm1, %v2773_v21  ;;  %3067 = vset.pattern.permute.xlu1 %v3143_v0  ;;  %vm213_vm11 = vcmp.eq.s32.totalorder %v3358_v35, %v129_v54  ;;  %v3862_v54 = vld [vmem:[%s4554_s1 + $0xf0] sm:$0xff] }
  0xf0   :  { %583 = vperm.xlu1 %3067, %v3557_v56   ;;  %2743 = vmatmul.msk.f32.gmra.mxu1 %vm745_vm2, %v2710_v22  ;;  %v2649_v58 = vsel %vm213_vm11, 1.0, %v3147_v39 }
  0xf1   :  { %2870 = vmatmul.msk.f32.gmra.mxu3 %vm310_vm1, %v2838_v20 }
  0xf2   :  { %3068 = vset.pattern.permute.xlu2 %v3146_v29 }
  0xf3   :  { %1022 = vperm.xlu2 %3068, %v3557_v56   ;;  %v566_v46 = vpop.permute.xlu2 %565 }
  0xf4   :  { %vm652_vm0 = vcmp.eq.s32.totalorder %v3358_v35, %v566_v46 }
  0xf5   :  { %v2712_v34 = vsel %vm652_vm0, 1.0, %v3147_v39  ;;  %vm1532_vm0 = vcmp.eq.s32.totalorder %v3358_v35, %v3523_v43 }
  0xf6   :  { %v120_v26 = vpop.permute.xlu1 %119 }
  0xf7   :  { %vm210_vm15 = vcmp.eq.s32.totalorder %v3358_v35, %v120_v26  ;;  %2806 = vmatmul.msk.f32.gmra.mxu2 %vm310_vm1, %v2774_v25 }
  0xf8   :  { %v2646_v28 = vsel %vm210_vm15, 1.0, %v3147_v39  ;;  %3069 = vset.pattern.permute.xlu1 %v3145_v16  ;;  %2744 = vmatmul.msk.f32.gmra.mxu1 %vm745_vm2, %v2711_v23  ;;  %v2716_v23 = vsel %vm656_vm7, 1.0, %v3147_v39 }
  0xf9   :  { %1461 = vperm.xlu1 %3069, %v3557_v56   ;;  %2678 = vmatmul.msk.f32.gmra.mxu0 %vm310_vm1, %v2646_v28  ;;  %v3706_v56 = vld [vmem:[%s4554_s1 + $0x78] sm:$0xff] }
  0xfa   :  { %2871 = vmatmul.msk.f32.gmra.mxu3 %vm310_vm1, %v2839_v27  ;;  %158 = vperm.xlu0 %3088, %v3706_v56   ;;  %v3717_v61 = vpop.f32.mrf.mxu2  ;;  %v3746_v32 = vpop.f32.mrf.mxu3 }
  0xfb   :  { %3070 = vset.pattern.permute.xlu2 %v3143_v0 }
  0xfc   :  { %586 = vperm.xlu2 %3070, %v3601_v12   ;;  %v1444_v30 = vpop.permute.xlu2 %1443 }
  0xfd   :  { %vm1530_vm8 = vcmp.eq.s32.totalorder %v3358_v35, %v1444_v30 }
  0xfe   :  { %v2841_v51 = vsel %vm1530_vm8, 1.0, %v3147_v39 }
  0xff   :  { %2807 = vmatmul.msk.f32.gmra.mxu2 %vm310_vm1, %v2775_v36  ;;  %v1002_v38 = vpop.permute.xlu1 %1001  ;;  %v3816_v36 = vld [vmem:[%s4554_s1 + $0xc8] sm:$0xff] }
 0x100   :  { %2745 = vmatmul.msk.f32.gmra.mxu1 %vm745_vm2, %v2712_v34  ;;  %vm1090_vm5 = vcmp.eq.s32.totalorder %v3358_v35, %v1002_v38 }
 0x101   :  { %3071 = vset.pattern.permute.xlu1 %v3146_v29  ;;  %2679 = vmatmul.msk.f32.gmra.mxu0 %vm310_vm1, %v2647_v37  ;;  %v2776_v41 = vsel %vm1090_vm5, 1.0, %v3147_v39 }
 0x102   :  { %1025 = vperm.xlu1 %3071, %v3601_v12   ;;  %3093 = vset.pattern.permute.xlu0 %v3145_v16  ;;  %v3733_v8 = vpop.f32.mrf.mxu2  ;;  %v3765_v20 = vpop.f32.mrf.mxu3 }
 0x103   :  { %1479 = vperm.xlu0 %3093, %v3740_v10  }
 0x104   :  { %3072 = vset.pattern.permute.xlu2 %v3144_v1 }
 0x105   :  { %146 = vperm.xlu2 %3072, %v3601_v12   ;;  %v1008_v40 = vpop.permute.xlu2 %1007  ;;  %v2843_v12 = vsel %vm1532_vm0, 1.0, %v3147_v39 }
 0x106   :  { %vm1092_vm9 = vcmp.eq.s32.totalorder %v3358_v35, %v1008_v40 }
 0x107   :  { %2808 = vmatmul.msk.f32.gmra.mxu2 %vm310_vm1, %v2776_v41  ;;  %v2778_v55 = vsel %vm1092_vm9, 1.0, %v3147_v39  ;;  %v3128_v41 = vld [vmem:[%s4554_s1 + $0x88] sm:$0xff] }
 0x108   :  { %v1441_v42 = vpop.permute.xlu1 %1440 }
 0x109   :  { %vm1529_vm6 = vcmp.eq.s32.totalorder %v3358_v35, %v1441_v42 }
 0x10a   :  { %v2840_v47 = vsel %vm1529_vm6, 1.0, %v3147_v39  ;;  %3074 = vset.pattern.permute.xlu1 %v3143_v0  ;;  %v3757_v43 = vpop.f32.mrf.mxu2 }
 0x10b   :  { %589 = vperm.xlu1 %3074, %v58_v44   ;;  %2872 = vmatmul.msk.f32.gmra.mxu3 %vm310_vm1, %v2840_v47  ;;  %v3785_v26 = vpop.f32.mrf.mxu3 }
 0x10c   :  { %1485 = vperm.xlu0 %3093, %v3223_v2  }
 0x10d   :  { %3075 = vset.pattern.permute.xlu2 %v3146_v29 }
 0x10e   :  { %1028 = vperm.xlu2 %3075, %v58_v44   ;;  %v572_v50 = vpop.permute.xlu2 %571 }
 0x10f   :  { %2809 = vmatmul.msk.f32.gmra.mxu2 %vm310_vm1, %v2777_v48  ;;  %vm654_vm14 = vcmp.eq.s32.totalorder %v3358_v35, %v572_v50 }
 0x110   :  { %v2714_v3 = vsel %vm654_vm14, 1.0, %v3147_v39 }
 0x111   :  { %v126_v52 = vpop.permute.xlu1 %125 }
 0x112   :  { %vm212_vm10 = vcmp.eq.s32.totalorder %v3358_v35, %v126_v52  ;;  %v3778_v22 = vpop.f32.mrf.mxu2  ;;  %v3130_v52 = vld [vmem:[%s4554_s1 + $0x90] sm:$0xff] }
 0x113   :  { %v2648_v53 = vsel %vm212_vm10, 1.0, %v3147_v39  ;;  %3076 = vset.pattern.permute.xlu1 %v3144_v1  ;;  %2873 = vmatmul.msk.f32.gmra.mxu3 %vm310_vm1, %v2841_v51  ;;  %v144_v51 = vpop.permute.xlu0 %143 }
 0x114   :  { %149 = vperm.xlu1 %3076, %v58_v44   ;;  %2680 = vmatmul.msk.f32.gmra.mxu0 %vm310_vm1, %v2648_v53 }
 0x115   :  { %3099 = vset.pattern.permute.xlu0 %v3146_v29 }
 0x116   :  { %3077 = vset.pattern.permute.xlu2 %v3145_v16  ;;  %1052 = vperm.xlu0 %3099, %v3238_v5  }
 0x117   :  { %2810 = vmatmul.msk.f32.gmra.mxu2 %vm310_vm1, %v2778_v55  ;;  %1467 = vperm.xlu2 %3077, %v58_v44   ;;  %v132_v57 = vpop.permute.xlu2 %131  ;;  %v3839_v44 = vld [vmem:[%s4554_s1 + $0xd8] sm:$0xff] }
 0x118   :  { %vm214_vm13 = vcmp.eq.s32.totalorder %v3358_v35, %v132_v57 }
 0x119   :  { %v2650_v63 = vsel %vm214_vm13, 1.0, %v3147_v39 }
 0x11a   :  { %v569_v59 = vpop.permute.xlu1 %568  ;;  %v3796_v27 = vpop.f32.mrf.mxu2 }
 0x11b   :  { %vm653_vm12 = vcmp.eq.s32.totalorder %v3358_v35, %v569_v59 }
 0x11c   :  { %v2713_v60 = vsel %vm653_vm12, 1.0, %v3147_v39  ;;  %3079 = vset.pattern.permute.xlu1 %v3146_v29  ;;  %2681 = vmatmul.msk.f32.gmra.mxu0 %vm310_vm1, %v2649_v58  ;;  %vm1096_vm12 = vcmp.eq.s32.totalorder %v3358_v35, %v3677_v45 }
 0x11d   :  { %1031 = vperm.xlu1 %3079, %v3655_v31   ;;  %2746 = vmatmul.msk.f32.gmra.mxu1 %vm745_vm2, %v2713_v60  ;;  %v2782_v37 = vsel %vm1096_vm12, 1.0, %v3147_v39  ;;  %v3132_v60 = vld [vmem:[%s4554_s1 + $0x98] sm:$0xff] }
 0x11e   :  { %3102 = vset.pattern.permute.xlu0 %v3145_v16 }
 0x11f   :  { %3080 = vset.pattern.permute.xlu2 %v3144_v1  ;;  %1497 = vperm.xlu0 %3102, %v3251_v7   ;;  %v3806_v7 = vpop.f32.mrf.mxu3 }
 0x120   :  { %152 = vperm.xlu2 %3080, %v3655_v31   ;;  %v1014_v62 = vpop.permute.xlu2 %1013 }
 0x121   :  { %vm1094_vm5 = vcmp.eq.s32.totalorder %v3358_v35, %v1014_v62 }
 0x122   :  { %v2780_v18 = vsel %vm1094_vm5, 1.0, %v3147_v39  ;;  %v3820_v38 = vpop.f32.mrf.mxu2 }
 0x123   :  { %v1447_v4 = vpop.permute.xlu1 %1446 }
 0x124   :  { %vm1531_vm15 = vcmp.eq.s32.totalorder %v3358_v35, %v1447_v4  ;;  %2682 = vmatmul.msk.f32.gmra.mxu0 %vm310_vm1, %v2650_v63 }
 0x125   :  { %v2842_v6 = vsel %vm1531_vm15, 1.0, %v3147_v39  ;;  %3081 = vset.pattern.permute.xlu1 %v3145_v16  ;;  %2747 = vmatmul.msk.f32.gmra.mxu1 %vm745_vm2, %v2714_v3 }
 0x126   :  { %1470 = vperm.xlu1 %3081, %v3655_v31   ;;  %2874 = vmatmul.msk.f32.gmra.mxu3 %vm310_vm1, %v2842_v6 }
 0x127   :  { %3105 = vset.pattern.permute.xlu0 %v3146_v29  ;;  %v3831_v42 = vpop.f32.mrf.mxu3 }
 0x128   :  { %3082 = vset.pattern.permute.xlu2 %v3143_v0  ;;  %1067 = vperm.xlu0 %3105, %v3816_v36  }
 0x129   :  { %595 = vperm.xlu2 %3082, %v3686_v49   ;;  %v1453_v9 = vpop.permute.xlu2 %1452 }
 0x12a   :  { %vm1533_vm4 = vcmp.eq.s32.totalorder %v3358_v35, %v1453_v9 }
 0x12b   :  { %v2844_v15 = vsel %vm1533_vm4, 1.0, %v3147_v39 }
 0x12c   :  { %v1011_v11 = vpop.permute.xlu1 %1010 }
 0x12d   :  { %vm1093_vm3 = vcmp.eq.s32.totalorder %v3358_v35, %v1011_v11 }
 0x12e   :  { %v2779_v13 = vsel %vm1093_vm3, 1.0, %v3147_v39  ;;  %3084 = vset.pattern.permute.xlu1 %v3144_v1  ;;  %2875 = vmatmul.msk.f32.gmra.mxu3 %vm310_vm1, %v2843_v12  ;;  %vm218_vm3 = vcmp.eq.s32.totalorder %v3358_v35, %v144_v51  ;;  %v3133_v12 = vld [vmem:[%s4554_s1 + $0xa0] sm:$0xff] }
 0x12f   :  { %155 = vperm.xlu1 %3084, %v3686_v49   ;;  %2811 = vmatmul.msk.f32.gmra.mxu2 %vm310_vm1, %v2779_v13  ;;  %v3857_v53 = vpop.f32.mrf.mxu3  ;;  %v3134_v13 = vld [vmem:[%s4554_s1 + $0xa8] sm:$0xff] }
 0x130   :  { %3108 = vset.pattern.permute.xlu0 %v3145_v16 }
 0x131   :  { %3085 = vset.pattern.permute.xlu2 %v3145_v16  ;;  %1512 = vperm.xlu0 %3108, %v3839_v44  }
 0x132   :  { %1473 = vperm.xlu2 %3085, %v3686_v49   ;;  %v138_v14 = vpop.permute.xlu2 %137  ;;  %v3844_v49 = vpop.f32.mrf.mxu2 }
 0x133   :  { %vm216_vm10 = vcmp.eq.s32.totalorder %v3358_v35, %v138_v14 }
 0x134   :  { %v2652_v28 = vsel %vm216_vm10, 1.0, %v3147_v39 }
 0x135   :  { %v575_v19 = vpop.permute.xlu1 %574 }
 0x136   :  { %vm655_vm6 = vcmp.eq.s32.totalorder %v3358_v35, %v575_v19  ;;  %2876 = vmatmul.msk.f32.gmra.mxu3 %vm310_vm1, %v2844_v15 }
 0x137   :  { %v2715_v21 = vsel %vm655_vm6, 1.0, %v3147_v39  ;;  %3086 = vset.pattern.permute.xlu1 %v3143_v0  ;;  %2812 = vmatmul.msk.f32.gmra.mxu2 %vm310_vm1, %v2780_v18  ;;  %v3880_v63 = vpop.f32.mrf.mxu3 }
 0x138   :  { %598 = vperm.xlu1 %3086, %v3706_v56   ;;  %2748 = vmatmul.msk.f32.gmra.mxu1 %vm745_vm2, %v2715_v21 }
 0x139   :  { %3111 = vset.pattern.permute.xlu0 %v3146_v29 }
 0x13a   :  { %3087 = vset.pattern.permute.xlu2 %v3146_v29  ;;  %1082 = vperm.xlu0 %3111, %v3862_v54   ;;  %v3867_v58 = vpop.f32.mrf.mxu2 }
 0x13b   :  { %1037 = vperm.xlu2 %3087, %v3706_v56   ;;  %v581_v2 = vpop.permute.xlu2 %580 }
 0x13c   :  { %vm657_vm9 = vcmp.eq.s32.totalorder %v3358_v35, %v581_v2 }
 0x13d   :  { %v2717_v24 = vsel %vm657_vm9, 1.0, %v3147_v39 }
 0x13e   :  { %v135_v46 = vpop.permute.xlu1 %134 }
 0x13f   :  { %vm215_vm8 = vcmp.eq.s32.totalorder %v3358_v35, %v135_v46  ;;  %v3900_v15 = vpop.f32.mrf.mxu3  ;;  %v3135_v46 = vld [vmem:[%s4554_s1 + $0xb0] sm:$0xff] }
 0x140   :  { %v2651_v25 = vsel %vm215_vm8, 1.0, %v3147_v39  ;;  %3089 = vset.pattern.permute.xlu1 %v3145_v16  ;;  %2749 = vmatmul.msk.f32.gmra.mxu1 %vm745_vm2, %v2716_v23 }
 0x141   :  { %1476 = vperm.xlu1 %3089, %v3706_v56   ;;  %2683 = vmatmul.msk.f32.gmra.mxu0 %vm310_vm1, %v2651_v25  ;;  %v2654_v56 = vsel %vm218_vm3, 1.0, %v3147_v39 }
 0x142   :  { %3115 = vset.pattern.permute.xlu0 %v3144_v1  ;;  %v3889_v11 = vpop.f32.mrf.mxu2 }
 0x143   :  { %3090 = vset.pattern.permute.xlu2 %v3143_v0 }
 0x144   :  { %601 = vperm.xlu2 %3090, %v3740_v10   ;;  %v1459_v5 = vpop.permute.xlu2 %1458 }
 0x145   :  { %vm1535_vm15 = vcmp.eq.s32.totalorder %v3358_v35, %v1459_v5 }
 0x146   :  { %v2846_v47 = vsel %vm1535_vm15, 1.0, %v3147_v39 }
 0x147   :  { %v1017_v30 = vpop.permute.xlu1 %1016 }
 0x148   :  { %vm1095_vm11 = vcmp.eq.s32.totalorder %v3358_v35, %v1017_v30  ;;  %2750 = vmatmul.msk.f32.gmra.mxu1 %vm745_vm2, %v2717_v24  ;;  %v3916_v24 = vpop.f32.mrf.mxu3 }
 0x149   :  { %v2781_v31 = vsel %vm1095_vm11, 1.0, %v3147_v39  ;;  %3091 = vset.pattern.permute.xlu1 %v3146_v29  ;;  %2684 = vmatmul.msk.f32.gmra.mxu0 %vm310_vm1, %v2652_v28 }
 0x14a   :  { %1040 = vperm.xlu1 %3091, %v3740_v10   ;;  %2813 = vmatmul.msk.f32.gmra.mxu2 %vm310_vm1, %v2781_v31  ;;  %v3907_v2 = vpop.f32.mrf.mxu2  ;;  %v3136_v31 = vld [vmem:[%s4554_s1 + $0xb8] sm:$0xff] }
 0x14c   :  { %3092 = vset.pattern.permute.xlu2 %v3144_v1 }
 0x14d   :  { %161 = vperm.xlu2 %3092, %v3740_v10   ;;  %v1023_v34 = vpop.permute.xlu2 %1022  ;;  %v1465_v10 = vpop.permute.xlu0 %1464 }
 0x14e   :  { %vm1097_vm14 = vcmp.eq.s32.totalorder %v3358_v35, %v1023_v34  ;;  %vm1537_vm8 = vcmp.eq.s32.totalorder %v3358_v35, %v1465_v10 }
 0x14f   :  { %v2783_v45 = vsel %vm1097_vm14, 1.0, %v3147_v39  ;;  %v2848_v18 = vsel %vm1537_vm8, 1.0, %v3147_v39 }
 0x150   :  { %v1456_v17 = vpop.permute.xlu1 %1455 }
 0x151   :  { %vm1534_vm13 = vcmp.eq.s32.totalorder %v3358_v35, %v1456_v17 }
 0x152   :  { %v2845_v40 = vsel %vm1534_vm13, 1.0, %v3147_v39  ;;  %3094 = vset.pattern.permute.xlu1 %v3143_v0  ;;  %2814 = vmatmul.msk.f32.gmra.mxu2 %vm310_vm1, %v2782_v37  ;;  %v3928_v37 = vpop.f32.mrf.mxu2 }
 0x153   :  { %604 = vperm.xlu1 %3094, %v3128_v41   ;;  %2877 = vmatmul.msk.f32.gmra.mxu3 %vm310_vm1, %v2845_v40 }
 0x155   :  { %3095 = vset.pattern.permute.xlu2 %v3146_v29  ;;  %v593_v34 = vpop.permute.xlu0 %592 }
 0x156   :  { %v587_v0 = vpop.permute.xlu2 %586  ;;  %1043 = vperm.xlu2 %3095, %v3128_v41   ;;  %vm661_vm13 = vcmp.eq.s32.totalorder %v3358_v35, %v593_v34  ;;  %v3140_v34 = vld [vmem:[%s4554_s1 + $0xe8] sm:$0xff] }
 0x157   :  { %vm659_vm6 = vcmp.eq.s32.totalorder %v3358_v35, %v587_v0  ;;  %v2721_v40 = vsel %vm661_vm13, 1.0, %v3147_v39  ;;  %v3932_v0 = vpop.f32.mrf.mxu3 }
 0x158   :  { %v2719_v4 = vsel %vm659_vm6, 1.0, %v3147_v39 }
 0x159   :  { %v141_v48 = vpop.permute.xlu1 %140 }
 0x15a   :  { %vm217_vm0 = vcmp.eq.s32.totalorder %v3358_v35, %v141_v48  ;;  %2815 = vmatmul.msk.f32.gmra.mxu2 %vm310_vm1, %v2783_v45  ;;  %v3137_v45 = vld [vmem:[%s4554_s1 + $0xc0] sm:$0xff]  ;;  %v3943_v48 = vpop.f32.mrf.mxu2 }
 0x15b   :  { %v2653_v50 = vsel %vm217_vm0, 1.0, %v3147_v39  ;;  %3096 = vset.pattern.permute.xlu1 %v3145_v16  ;;  %2878 = vmatmul.msk.f32.gmra.mxu3 %vm310_vm1, %v2846_v47 }
 0x15c   :  { %1482 = vperm.xlu1 %3096, %v3128_v41   ;;  %2685 = vmatmul.msk.f32.gmra.mxu0 %vm310_vm1, %v2653_v50 }
 0x15e   :  { %1046 = vperm.xlu2 %3095, %v3130_v52  }
 0x15f   :  { %v147_v55 = vpop.permute.xlu2 %146 }
 0x160   :  { %vm219_vm5 = vcmp.eq.s32.totalorder %v3358_v35, %v147_v55 }
 0x161   :  { %v2655_v3 = vsel %vm219_vm5, 1.0, %v3147_v39 }
 0x162   :  { %v584_v57 = vpop.permute.xlu1 %583 }
 0x163   :  { %vm658_vm4 = vcmp.eq.s32.totalorder %v3358_v35, %v584_v57 }
 0x164   :  { %v2718_v59 = vsel %vm658_vm4, 1.0, %v3147_v39  ;;  %3097 = vset.pattern.permute.xlu1 %v3146_v29  ;;  %2686 = vmatmul.msk.f32.gmra.mxu0 %vm310_vm1, %v2654_v56  ;;  %v3951_v56 = vpop.f32.mrf.mxu3 }
 0x165   :  { %1049 = vperm.xlu1 %3097, %v3132_v60   ;;  %2751 = vmatmul.msk.f32.gmra.mxu1 %vm745_vm2, %v2718_v59  ;;  %v1035_v59 = vpop.permute.xlu0 %1034 }
 0x166   :  { %3098 = vset.pattern.permute.xlu2 %v3145_v16  ;;  %vm1101_vm4 = vcmp.eq.s32.totalorder %v3358_v35, %v1035_v59 }
 0x167   :  { %1488 = vperm.xlu2 %3098, %v3132_v60   ;;  %v3138_v60 = vld [vmem:[%s4554_s1 + $0xd0] sm:$0xff] }
 0x168   :  { %v1029_v62 = vpop.permute.xlu2 %1028 }
 0x169   :  { %vm1099_vm11 = vcmp.eq.s32.totalorder %v3358_v35, %v1029_v62  ;;  %v2787_v62 = vsel %vm1101_vm4, 1.0, %v3147_v39 }
 0x16a   :  { %v2785_v5 = vsel %vm1099_vm11, 1.0, %v3147_v39 }
 0x16b   :  { %v1462_v6 = vpop.permute.xlu1 %1461 }
 0x16c   :  { %vm1536_vm7 = vcmp.eq.s32.totalorder %v3358_v35, %v1462_v6  ;;  %2687 = vmatmul.msk.f32.gmra.mxu0 %vm310_vm1, %v2655_v3 }
 0x16d   :  { %v2847_v9 = vsel %vm1536_vm7, 1.0, %v3147_v39  ;;  %3100 = vset.pattern.permute.xlu1 %v3145_v16  ;;  %2752 = vmatmul.msk.f32.gmra.mxu1 %vm745_vm2, %v2719_v4 }
 0x16e   :  { %1491 = vperm.xlu1 %3100, %v3133_v12   ;;  %2879 = vmatmul.msk.f32.gmra.mxu3 %vm310_vm1, %v2847_v9  ;;  %v3968_v9 = vpop.f32.mrf.mxu3  ;;  %v1944_v12 = vld [vmem:[%s4560_s7 + $0x38] sm:$0xff] }
 0x16f   :  { %3101 = vset.pattern.permute.xlu2 %v3146_v29  ;;  %2054 = vmatpush.msrb.mxu1 %v1944_v12 }
 0x170   :  { %1055 = vperm.xlu2 %3101, %v3134_v13  }
 0x171   :  { %v1468_v14 = vpop.permute.xlu2 %1467 }
 0x172   :  { %vm1538_vm10 = vcmp.eq.s32.totalorder %v3358_v35, %v1468_v14 }
 0x173   :  { %v2849_v25 = vsel %vm1538_vm10, 1.0, %v3147_v39 }
 0x174   :  { %v1026_v19 = vpop.permute.xlu1 %1025 }
 0x175   :  { %vm1098_vm9 = vcmp.eq.s32.totalorder %v3358_v35, %v1026_v19 }
 0x176   :  { %v2784_v21 = vsel %vm1098_vm9, 1.0, %v3147_v39  ;;  %1494 = vperm.xlu1 %3100, %v3134_v13   ;;  %2880 = vmatmul.msk.f32.gmra.mxu3 %vm310_vm1, %v2848_v18  ;;  %v3139_v18 = vld [vmem:[%s4554_s1 + $0xe0] sm:$0xff] }
 0x177   :  { %2816 = vmatmul.msk.f32.gmra.mxu2 %vm310_vm1, %v2784_v21  ;;  %v1943_v21 = vld [vmem:[%s4560_s7 + $0x30] sm:$0xff] }
 0x178   :  { %1058 = vperm.xlu2 %3101, %v3135_v46   ;;  %2055 = vmatpush.msrb.mxu1 %v1943_v21 }
 0x17a   :  { %v153_v23 = vpop.permute.xlu2 %152 }
 0x17b   :  { %vm221_vm0 = vcmp.eq.s32.totalorder %v3358_v35, %v153_v23  ;;  %v159_v23 = vpop.permute.xlu0 %158 }
 0x17c   :  { %v2657_v52 = vsel %vm221_vm0, 1.0, %v3147_v39  ;;  %vm223_vm9 = vcmp.eq.s32.totalorder %v3358_v35, %v159_v23 }
 0x17d   :  { %v590_v28 = vpop.permute.xlu1 %589 }
 0x17e   :  { %vm660_vm12 = vcmp.eq.s32.totalorder %v3358_v35, %v590_v28  ;;  %3103 = vset.pattern.permute.xlu1 %v3146_v29  ;;  %2881 = vmatmul.msk.f32.gmra.mxu3 %vm310_vm1, %v2849_v25  ;;  %v1942_v25 = vld [vmem:[%s4560_s7 + $0x28] sm:$0xff]  ;;  %v1941_v28 = vld [vmem:[%s4560_s7 + $0x20] sm:$0xff] }
 0x17f   :  { %v2720_v30 = vsel %vm660_vm12, 1.0, %v3147_v39  ;;  %1061 = vperm.xlu1 %3103, %v3136_v31   ;;  %2817 = vmatmul.msk.f32.gmra.mxu2 %vm310_vm1, %v2785_v5  ;;  %v3996_v5 = vpop.f32.mrf.mxu3 }
 0x180   :  { %2753 = vmatmul.msk.f32.gmra.mxu1 %vm745_vm2, %v2720_v30  ;;  %3104 = vset.pattern.permute.xlu2 %v3145_v16  ;;  %v1940_v30 = vld [vmem:[%s4560_s7 + $0x18] sm:$0xff] }
 0x181   :  { %1500 = vperm.xlu2 %3104, %v3136_v31   ;;  %2056 = vmatpush.msrb.mxu1 %v1942_v25  ;;  %v2659_v31 = vsel %vm223_vm9, 1.0, %v3147_v39  ;;  %v79_v25 = vld [vmem:[%s4561_s0 + $0x8] sm:$0xff] }
 0x183   :  { %v596_v17 = vpop.permute.xlu2 %595  ;;  %2057 = vmatpush.msrb.mxu1 %v1941_v28 }
 0x184   :  { %vm662_vm15 = vcmp.eq.s32.totalorder %v3358_v35, %v596_v17  ;;  %v1939_v17 = vld [vmem:[%s4560_s7 + $0x10] sm:$0xff] }
 0x185   :  { %v2722_v50 = vsel %vm662_vm15, 1.0, %v3147_v39  ;;  %2058 = vmatpush.msrb.mxu1 %v1940_v30 }
 0x186   :  { %v150_v41 = vpop.permute.xlu1 %149 }
 0x187   :  { %vm220_vm14 = vcmp.eq.s32.totalorder %v3358_v35, %v150_v41  ;;  %1064 = vperm.xlu1 %3103, %v3137_v45   ;;  %2059 = vmatpush.msrb.mxu1 %v1939_v17 }
 0x188   :  { %v2656_v47 = vsel %vm220_vm14, 1.0, %v3147_v39  ;;  %2754 = vmatmul.msk.f32.gmra.mxu1 %vm745_vm2, %v2721_v40 }
 0x189   :  { %2688 = vmatmul.msk.f32.gmra.mxu0 %vm310_vm1, %v2656_v47  ;;  %1503 = vperm.xlu2 %3104, %v3137_v45  }
 0x18c   :  { %v1474_v51 = vpop.permute.xlu2 %1473 }
 0x18d   :  { %vm1540_vm7 = vcmp.eq.s32.totalorder %v3358_v35, %v1474_v51  ;;  %v1937_v51 = vld [vmem:[%s4560_s7] sm:$0xff] }
 0x18e   :  { %v2851_v14 = vsel %vm1540_vm7, 1.0, %v3147_v39 }
 0x18f   :  { %v1032_v55 = vpop.permute.xlu1 %1031  ;;  %3106 = vset.pattern.permute.xlu1 %v3145_v16 }
 0x190   :  { %vm1100_vm3 = vcmp.eq.s32.totalorder %v3358_v35, %v1032_v55  ;;  %1506 = vperm.xlu1 %3106, %v3816_v36   ;;  %2755 = vmatmul.msk.f32.gmra.mxu1 %vm745_vm2, %v2722_v50  ;;  %v3961_v36 = vpop.f32.mrf.mxu2  ;;  %v1938_v50 = vld [vmem:[%s4560_s7 + $0x8] sm:$0xff]  ;;  %v424_v55 = vpop.f32.mrf.mxu0 }
 0x191   :  { %v2786_v57 = vsel %vm1100_vm3, 1.0, %v3147_v39  ;;  %2689 = vmatmul.msk.f32.gmra.mxu0 %vm310_vm1, %v2657_v52  ;;  %3107 = vset.pattern.permute.xlu2 %v3146_v29  ;;  %v4025_v52 = vpop.f32.mrf.mxu3 }
 0x192   :  { %2818 = vmatmul.msk.f32.gmra.mxu2 %vm310_vm1, %v2786_v57  ;;  %1070 = vperm.xlu2 %3107, %v3138_v60  }
 0x193   :  { %2060 = vmatpush.msrb.mxu1 %v1938_v50 }
 0x195   :  { %v1038_v3 = vpop.permute.xlu2 %1037  ;;  %2061 = vmatpush.msrb.mxu1 %v1937_v51 }
 0x196   :  { %vm1102_vm6 = vcmp.eq.s32.totalorder %v3358_v35, %v1038_v3 }
 0x197   :  { %v2788_v10 = vsel %vm1102_vm6, 1.0, %v3147_v39 }
 0x198   :  { %v1471_v4 = vpop.permute.xlu1 %1470  ;;  %1509 = vperm.xlu1 %3106, %v3138_v60   ;;  %v3977_v13 = vpop.f32.mrf.mxu2 }
 0x199   :  { %vm1539_vm5 = vcmp.eq.s32.totalorder %v3358_v35, %v1471_v4  ;;  %v1480_v4 = vpop.permute.xlu0 %1479 }
 0x19a   :  { %v2850_v6 = vsel %vm1539_vm5, 1.0, %v3147_v39  ;;  %2819 = vmatmul.msk.f32.gmra.mxu2 %vm310_vm1, %v2787_v62  ;;  %1073 = vperm.xlu2 %3107, %v3839_v44   ;;  %vm1542_vm14 = vcmp.eq.s32.totalorder %v3358_v35, %v1480_v4  ;;  %vm1949_vm5 = vcmask 523264  }
 0x19b   :  { %2882 = vmatmul.msk.f32.gmra.mxu3 %vm310_vm1, %v2850_v6  ;;  %v427_v6 = vpop.f32.mrf.mxu0  ;;  %v2853_v12 = vsel %vm1542_vm14, 1.0, %v3147_v39 }
 0x19e   :  { %v602_v19 = vpop.permute.xlu2 %601 }
 0x19f   :  { %vm664_vm12 = vcmp.eq.s32.totalorder %v3358_v35, %v602_v19 }
 0x1a0   :  { %3109 = vset.pattern.permute.xlu1 %v3146_v29  ;;  %v4012_v41 = vpop.f32.mrf.mxu2  ;;  %v2724_v59 = vsel %vm664_vm12, 1.0, %v3147_v39 }
 0x1a1   :  { %v156_v44 = vpop.permute.xlu1 %155  ;;  %1076 = vperm.xlu1 %3109, %v3139_v18  }
 0x1a2   :  { %vm222_vm8 = vcmp.eq.s32.totalorder %v3358_v35, %v156_v44  ;;  %2820 = vmatmul.msk.f32.gmra.mxu2 %vm310_vm1, %v2788_v10  ;;  %3110 = vset.pattern.permute.xlu2 %v3145_v16  ;;  %v1741_v10 = vpop.f32.mrf.mxu3 }
 0x1a3   :  { %v2658_v46 = vsel %vm222_vm8, 1.0, %v3147_v39  ;;  %2883 = vmatmul.msk.f32.gmra.mxu3 %vm310_vm1, %v2851_v14  ;;  %1515 = vperm.xlu2 %3110, %v3139_v18   ;;  %v430_v28 = vpop.f32.mrf.mxu0 }
 0x1a4   :  { %2690 = vmatmul.msk.f32.gmra.mxu0 %vm310_vm1, %v2658_v46 }
 0x1a7   :  { %v162_v45 = vpop.permute.xlu2 %161 }
 0x1a8   :  { %vm224_vm11 = vcmp.eq.s32.totalorder %v3358_v35, %v162_v45  ;;  %v1302_v62 = vpop.f32.mrf.mxu2  ;;  %v4059_v45 = vld [vmem:[%s4559_s6] ss:$0 sm:$0xff] }
 0x1a9   :  { %1079 = vperm.xlu1 %3109, %v3140_v34   ;;  %v2660_v57 = vsel %vm224_vm11, 1.0, %v3147_v39 }
 0x1aa   :  { %v599_v40 = vpop.permute.xlu1 %598  ;;  %v1744_v30 = vpop.f32.mrf.mxu3 }
 0x1ab   :  { %vm663_vm10 = vcmp.eq.s32.totalorder %v3358_v35, %v599_v40  ;;  %1518 = vperm.xlu2 %3110, %v3140_v34   ;;  %v521_v34 = vadd.f32 %v427_v6, %v79_v25 }
 0x1ac   :  { %v2723_v47 = vsel %vm663_vm10, 1.0, %v3147_v39  ;;  %2691 = vmatmul.msk.f32.gmra.mxu0 %vm310_vm1, %v2659_v31 }
 0x1ad   :  { %2756 = vmatmul.msk.f32.gmra.mxu1 %vm745_vm2, %v2723_v47 }
 0x1b0   :  { %v1044_v18 = vpop.permute.xlu2 %1043  ;;  %v1305_v21 = vpop.f32.mrf.mxu2 }
 0x1b1   :  { %3112 = vset.pattern.permute.xlu1 %v3145_v16  ;;  %v3141_v16 = vld [vmem:[%s4554_s1 + $0xf8] sm:$0xff]  ;;  %vm1104_vm0 = vcmp.eq.s32.totalorder %v3358_v35, %v1044_v18 }
 0x1b2   :  { %1521 = vperm.xlu1 %3112, %v3862_v54   ;;  %v863_v54 = vpop.f32.mrf.mxu1  ;;  %v1747_v4 = vpop.f32.mrf.mxu3  ;;  %v81_v18 = vld [vmem:[%s4561_s0 + $0x18] sm:$0xff] }
 0x1b3   :  { %v1477_v60 = vpop.permute.xlu1 %1476  ;;  %3113 = vset.pattern.permute.xlu2 %v3146_v29  ;;  %v78_v29 = vld [vmem:[%s4561_s0] sm:$0xff] }
 0x1b4   :  { %vm1541_vm13 = vcmp.eq.s32.totalorder %v3358_v35, %v1477_v60  ;;  %2692 = vmatmul.msk.f32.gmra.mxu0 %vm310_vm1, %v2660_v57  ;;  %1085 = vperm.xlu2 %3113, %v3141_v16   ;;  %v520_v14 = vadd.f32 %v424_v55, %v78_v29  ;;  %v80_v57 = vld [vmem:[%s4561_s0 + $0x10] sm:$0xff]  ;;  %v433_v60 = vpop.f32.mrf.mxu0 }
 0x1b5   :  { %v2852_v3 = vsel %vm1541_vm13, 1.0, %v3147_v39  ;;  %2757 = vmatmul.msk.f32.gmra.mxu1 %vm745_vm2, %v2724_v59 }
 0x1b6   :  { %2884 = vmatmul.msk.f32.gmra.mxu3 %vm310_vm1, %v2852_v3  ;;  %v959_v46 = vadd.f32 %v863_v54, %v520_v14 }
 0x1b8   :  { %v1398_v31 = vadd.f32 %v1302_v62, %v959_v46  ;;  %v1047_v47 = vpop.permute.xlu2 %1046  ;;  %v1308_v59 = vpop.f32.mrf.mxu2 }
 0x1b9   :  { %vm1105_vm4 = vcmp.eq.s32.totalorder %v3358_v35, %v1047_v47 }
 0x1ba   :  { %1524 = vperm.xlu1 %3112, %v3141_v16   ;;  %v866_v23 = vpop.f32.mrf.mxu1  ;;  %v1837_v40 = vadd.f32 %v1741_v10, %v1398_v31  ;;  %v522_v16 = vadd.f32 %v430_v28, %v80_v57  ;;  %v2791_v54 = vsel %vm1105_vm4, 1.0, %v3147_v39  ;;  %v1750_v28 = vpop.f32.mrf.mxu3 }
 0x1bb   :  { %v960_v51 = vadd.f32 %v866_v23, %v521_v34 }
 0x1bc   :  { %v1041_v44 = vpop.permute.xlu1 %1040  ;;  %3114 = vset.pattern.permute.xlu2 %v3144_v1  ;;  %v2790_v1 = vsel %vm1104_vm0, 1.0, %v3147_v39  ;;  %v1873_v62 = vadd.f32 %v4059_v45, %v1837_v40 }
 0x1bd   :  { %vm1103_vm15 = vcmp.eq.s32.totalorder %v3358_v35, %v1041_v44  ;;  %v1399_v3 = vadd.f32 %v1305_v21, %v960_v51  ;;  %v1486_v21 = vpop.permute.xlu0 %1485 }
 0x1be   :  { %v2789_v19 = vsel %vm1103_vm15, 1.0, %v3147_v39  ;;  %2885 = vmatmul.msk.f32.gmra.mxu3 %vm310_vm1, %v2853_v12  ;;  %v1905_v29 = vmax.f32 %v1873_v62, 0.0  ;;  %vm1544_vm6 = vcmp.eq.s32.totalorder %v3358_v35, %v1486_v21 }
 0x1bf   :  { %2821 = vmatmul.msk.f32.gmra.mxu2 %vm310_vm1, %v2789_v19  ;;  %v1838_v6 = vadd.f32 %v1744_v30, %v1399_v3  ;;  %v436_v19 = vpop.f32.mrf.mxu0  ;;  %v523_v30 = vadd.f32 %v433_v60, %v81_v18 }
 0x1c0   :  { %v1311_v25 = vpop.f32.mrf.mxu2 }
 0x1c1   :  { %v1874_v46 = vadd.f32 %v4059_v45, %v1838_v6  ;;  %v1489_v40 = vpop.permute.xlu2 %1488 }
 0x1c2   :  { %v869_v55 = vpop.f32.mrf.mxu1  ;;  %vm1545_vm8 = vcmp.eq.s32.totalorder %v3358_v35, %v1489_v40 }
 0x1c3   :  { %v961_v12 = vadd.f32 %v869_v55, %v522_v16  ;;  %v1906_v34 = vmax.f32 %v1874_v46, 0.0  ;;  %v1753_v16 = vpop.f32.mrf.mxu3  ;;  %v2856_v6 = vsel %vm1545_vm8, 1.0, %v3147_v39 }
 0x1c5   :  { %v605_v17 = vpop.permute.xlu1 %604  ;;  %v1400_v23 = vadd.f32 %v1308_v59, %v961_v12  ;;  %v1053_v55 = vpop.permute.xlu0 %1052 }
 0x1c6   :  { %vm665_vm3 = vcmp.eq.s32.totalorder %v3358_v35, %v605_v17  ;;  %vm1107_vm9 = vcmp.eq.s32.totalorder %v3358_v35, %v1053_v55 }
 0x1c7   :  { %v2725_v50 = vsel %vm665_vm3, 1.0, %v3147_v39  ;;  %2822 = vmatmul.msk.f32.gmra.mxu2 %vm310_vm1, %v2790_v1  ;;  %v1839_v31 = vadd.f32 %v1747_v4, %v1400_v23  ;;  %v82_v1 = vld [vmem:[%s4561_s0 + $0x20] sm:$0xff]  ;;  %v439_v3 = vpop.f32.mrf.mxu0  ;;  %v2793_v12 = vsel %vm1107_vm9, 1.0, %v3147_v39 }
 0x1c8   :  { %2758 = vmatmul.msk.f32.gmra.mxu1 %vm745_vm2, %v2725_v50  ;;  %v2855_v50 = vsel %vm1544_vm6, 1.0, %v3147_v39  ;;  %v524_v60 = vadd.f32 %v436_v19, %v82_v1  ;;  %v1314_v62 = vpop.f32.mrf.mxu2 }
 0x1c9   :  { %v1875_v57 = vadd.f32 %v4059_v45, %v1839_v31 }
 0x1ca   :  { %v872_v14 = vpop.f32.mrf.mxu1  ;;  %v1056_v18 = vpop.permute.xlu2 %1055 }
 0x1cb   :  { %v962_v47 = vadd.f32 %v872_v14, %v523_v30  ;;  %vm1108_vm11 = vcmp.eq.s32.totalorder %v3358_v35, %v1056_v18  ;;  %v1756_v30 = vpop.f32.mrf.mxu3 }
 0x1cd   :  { %v1401_v4 = vadd.f32 %v1311_v25, %v962_v47  ;;  %v84_v47 = vld [vmem:[%s4561_s0 + $0x30] sm:$0xff] }
 0x1ce   :  { %v1483_v10 = vpop.permute.xlu1 %1482 }
 0x1cf   :  { %vm1543_vm2 = vcmp.eq.s32.totalorder %v3358_v35, %v1483_v10  ;;  %2823 = vmatmul.msk.f32.gmra.mxu2 %vm310_vm1, %v2791_v54  ;;  %v1840_v54 = vadd.f32 %v1750_v28, %v1401_v4  ;;  %v1907_v10 = vmax.f32 %v1875_v57, 0.0  ;;  %v442_v23 = vpop.f32.mrf.mxu0 }
 0x1d0   :  { %v2854_v44 = vsel %vm1543_vm2, 1.0, %v3147_v39  ;;  %2901 = vmatmul.msk.f32.vlgmr.msrb.gmra.mxu1 %vm1949_vm5, %v1905_v29  ;;  %v1317_v28 = vpop.f32.mrf.mxu2  ;;  %v526_v57 = vadd.f32 %v442_v23, %v84_v47 }
 0x1d1   :  { %2886 = vmatmul.msk.f32.gmra.mxu3 %vm310_vm1, %v2854_v44  ;;  %v83_v44 = vld [vmem:[%s4561_s0 + $0x28] sm:$0xff]  ;;  %v1876_v19 = vadd.f32 %v4059_v45, %v1840_v54 }
 0x1d2   :  { %v875_v59 = vpop.f32.mrf.mxu1  ;;  %v525_v25 = vadd.f32 %v439_v3, %v83_v44 }
 0x1d3   :  { %v963_v29 = vadd.f32 %v875_v59, %v524_v60  ;;  %v1908_v1 = vmax.f32 %v1876_v19, 0.0  ;;  %v1059_v60 = vpop.permute.xlu2 %1058 }
 0x1d4   :  { %vm1109_vm13 = vcmp.eq.s32.totalorder %v3358_v35, %v1059_v60 }
 0x1d5   :  { %v1402_v21 = vadd.f32 %v1314_v62, %v963_v29  ;;  %v1759_v29 = vpop.f32.mrf.mxu3  ;;  %v2795_v44 = vsel %vm1109_vm13, 1.0, %v3147_v39 }
 0x1d7   :  { %v1050_v17 = vpop.permute.xlu1 %1049  ;;  %v1841_v31 = vadd.f32 %v1753_v16, %v1402_v21  ;;  %v445_v59 = vpop.f32.mrf.mxu0 }
 0x1d8   :  { %vm1106_vm7 = vcmp.eq.s32.totalorder %v3358_v35, %v1050_v17  ;;  %2902 = vmatmul.msk.f32.gmra.mxu1 %vm1949_vm5, %v1906_v34  ;;  %v2794_v17 = vsel %vm1108_vm11, 1.0, %v3147_v39  ;;  %v1320_v3 = vpop.f32.mrf.mxu2 }
 0x1d9   :  { %v2792_v51 = vsel %vm1106_vm7, 1.0, %v3147_v39  ;;  %2887 = vmatmul.msk.f32.gmra.mxu3 %vm310_vm1, %v2855_v50 }
 0x1da   :  { %2824 = vmatmul.msk.f32.gmra.mxu2 %vm310_vm1, %v2792_v51  ;;  %v878_v46 = vpop.f32.mrf.mxu1  ;;  %v1877_v51 = vadd.f32 %v4059_v45, %v1841_v31 }
 0x1db   :  { %v964_v40 = vadd.f32 %v878_v46, %v525_v25 }
 0x1dc   :  { %v1909_v16 = vmax.f32 %v1877_v51, 0.0  ;;  %v86_v51 = vld [vmem:[%s4561_s0 + $0x40] sm:$0xff] }
 0x1dd   :  { %v1403_v62 = vadd.f32 %v1317_v28, %v964_v40  ;;  %v1501_v40 = vpop.permute.xlu2 %1500 }
 0x1de   :  { %vm1549_vm0 = vcmp.eq.s32.totalorder %v3358_v35, %v1501_v40  ;;  %v88_v40 = vld [vmem:[%s4561_s0 + $0x50] sm:$0xff] }
 0x1df   :  { %v1842_v4 = vadd.f32 %v1756_v30, %v1403_v62  ;;  %v448_v28 = vpop.f32.mrf.mxu0 }
 0x1e0   :  { %v1492_v14 = vpop.permute.xlu1 %1491  ;;  %2903 = vmatmul.msk.f32.gmra.mxu1 %vm1949_vm5, %v1907_v10  ;;  %v1323_v25 = vpop.f32.mrf.mxu2 }
 0x1e1   :  { %2888 = vmatmul.msk.f32.gmra.mxu3 %vm310_vm1, %v2856_v6  ;;  %vm1546_vm10 = vcmp.eq.s32.totalorder %v3358_v35, %v1492_v14  ;;  %v85_v6 = vld [vmem:[%s4561_s0 + $0x38] sm:$0xff]  ;;  %v1878_v19 = vadd.f32 %v4059_v45, %v1842_v4  ;;  %v528_v4 = vadd.f32 %v448_v28, %v86_v51 }
 0x1e2   :  { %2825 = vmatmul.msk.f32.gmra.mxu2 %vm310_vm1, %v2793_v12  ;;  %v2857_v34 = vsel %vm1546_vm10, 1.0, %v3147_v39  ;;  %v881_v55 = vpop.f32.mrf.mxu1  ;;  %v1498_v12 = vpop.permute.xlu0 %1497  ;;  %v527_v46 = vadd.f32 %v445_v59, %v85_v6 }
 0x1e3   :  { %v965_v54 = vadd.f32 %v881_v55, %v526_v57  ;;  %vm1548_vm14 = vcmp.eq.s32.totalorder %v3358_v35, %v1498_v12 }
 0x1e4   :  { %v2859_v31 = vsel %vm1548_vm14, 1.0, %v3147_v39 }
 0x1e5   :  { %v1404_v14 = vadd.f32 %v1320_v3, %v965_v54 }
 0x1e7   :  { %v1843_v23 = vadd.f32 %v1759_v29, %v1404_v14  ;;  %v451_v62 = vpop.f32.mrf.mxu0  ;;  %v87_v29 = vld [vmem:[%s4561_s0 + $0x48] sm:$0xff] }
 0x1e8   :  { %2904 = vmatmul.msk.f32.gmra.mxu1 %vm1949_vm5, %v1908_v1  ;;  %v1495_v50 = vpop.permute.xlu1 %1494  ;;  %v1762_v1 = vpop.f32.mrf.mxu3 }
 0x1e9   :  { %2889 = vmatmul.msk.f32.gmra.mxu3 %vm310_vm1, %v2857_v34  ;;  %vm1547_vm12 = vcmp.eq.s32.totalorder %v3358_v35, %v1495_v50  ;;  %v1910_v34 = vmax.f32 %v1878_v19, 0.0  ;;  %v1879_v47 = vadd.f32 %v4059_v45, %v1843_v23  ;;  %v1326_v60 = vpop.f32.mrf.mxu2 }
 0x1ea   :  { %2826 = vmatmul.msk.f32.gmra.mxu2 %vm310_vm1, %v2794_v17  ;;  %v2858_v10 = vsel %vm1547_vm12, 1.0, %v3147_v39  ;;  %v884_v21 = vpop.f32.mrf.mxu1  ;;  %v1068_v12 = vpop.permute.xlu0 %1067 }
 0x1eb   :  { %v966_v30 = vadd.f32 %v884_v21, %v527_v46  ;;  %v1911_v59 = vmax.f32 %v1879_v47, 0.0  ;;  %vm1112_vm4 = vcmp.eq.s32.totalorder %v3358_v35, %v1068_v12 }
 0x1ed   :  { %v1405_v50 = vadd.f32 %v1323_v25, %v966_v30 }
 0x1ef   :  { %v1844_v3 = vadd.f32 %v1762_v1, %v1405_v50  ;;  %v454_v30 = vpop.f32.mrf.mxu0 }
 0x1f0   :  { %2905 = vmatmul.msk.f32.gmra.mxu1 %vm1949_vm5, %v1909_v16  ;;  %v2860_v16 = vsel %vm1549_vm0, 1.0, %v3147_v39  ;;  %v1765_v54 = vpop.f32.mrf.mxu3 }
 0x1f1   :  { %2890 = vmatmul.msk.f32.gmra.mxu3 %vm310_vm1, %v2858_v10  ;;  %v1062_v18 = vpop.permute.xlu1 %1061  ;;  %v1504_v10 = vpop.permute.xlu2 %1503  ;;  %v1880_v14 = vadd.f32 %v4059_v45, %v1844_v3 }
 0x1f2   :  { %2827 = vmatmul.msk.f32.gmra.mxu2 %vm310_vm1, %v2795_v44  ;;  %vm1110_vm15 = vcmp.eq.s32.totalorder %v3358_v35, %v1062_v18  ;;  %v887_v57 = vpop.f32.mrf.mxu1  ;;  %v529_v18 = vadd.f32 %v451_v62, %v87_v29  ;;  %v1329_v46 = vpop.f32.mrf.mxu2  ;;  %vm1550_vm2 = vcmp.eq.s32.totalorder %v3358_v35, %v1504_v10  ;;  %v89_v29 = vld [vmem:[%s4561_s0 + $0x58] sm:$0xff] }
 0x1f3   :  { %v2796_v17 = vsel %vm1110_vm15, 1.0, %v3147_v39  ;;  %v967_v44 = vadd.f32 %v887_v57, %v528_v4  ;;  %v1912_v23 = vmax.f32 %v1880_v14, 0.0  ;;  %v2861_v1 = vsel %vm1550_vm2, 1.0, %v3147_v39 }
 0x1f5   :  { %v1406_v19 = vadd.f32 %v1326_v60, %v967_v44 }
 0x1f7   :  { %v1845_v25 = vadd.f32 %v1765_v54, %v1406_v19  ;;  %v457_v4 = vpop.f32.mrf.mxu0 }
 0x1f8   :  { %2906 = vmatmul.msk.f32.gmra.mxu1 %vm1949_vm5, %v1910_v34  ;;  %v2798_v34 = vsel %vm1112_vm4, 1.0, %v3147_v39 }
 0x1f9   :  { %2891 = vmatmul.msk.f32.gmra.mxu3 %vm310_vm1, %v2859_v31  ;;  %v1065_v55 = vpop.permute.xlu1 %1064  ;;  %v1071_v47 = vpop.permute.xlu2 %1070  ;;  %v1881_v50 = vadd.f32 %v4059_v45, %v1845_v25  ;;  %v90_v25 = vld [vmem:[%s4561_s0 + $0x60] sm:$0xff] }
 0x1fa   :  { %2828 = vmatmul.msk.f32.gmra.mxu2 %vm310_vm1, %v2796_v17  ;;  %vm1111_vm3 = vcmp.eq.s32.totalorder %v3358_v35, %v1065_v55  ;;  %v890_v21 = vpop.f32.mrf.mxu1  ;;  %v1768_v17 = vpop.f32.mrf.mxu3  ;;  %v530_v55 = vadd.f32 %v454_v30, %v88_v40  ;;  %vm1113_vm7 = vcmp.eq.s32.totalorder %v3358_v35, %v1071_v47 }
 0x1fb   :  { %v2797_v6 = vsel %vm1111_vm3, 1.0, %v3147_v39  ;;  %v968_v28 = vadd.f32 %v890_v21, %v529_v18  ;;  %v1332_v3 = vpop.f32.mrf.mxu2  ;;  %v531_v18 = vadd.f32 %v457_v4, %v89_v29 }
 0x1fd   :  { %v1407_v51 = vadd.f32 %v1329_v46, %v968_v28 }
 0x1ff   :  { %v1846_v60 = vadd.f32 %v1768_v17, %v1407_v51 }
 0x200   :  { %2907 = vmatmul.msk.f32.gmra.mxu1 %vm1949_vm5, %v1911_v59  ;;  %v1913_v59 = vmax.f32 %v1881_v50, 0.0 }
 0x201   :  { %2892 = vmatmul.msk.f32.gmra.mxu3 %vm310_vm1, %v2860_v16  ;;  %v2799_v16 = vsel %vm1113_vm7, 1.0, %v3147_v39  ;;  %v1882_v12 = vadd.f32 %v4059_v45, %v1846_v60  ;;  %v1074_v14 = vpop.permute.xlu2 %1073 }
 0x202   :  { %2829 = vmatmul.msk.f32.gmra.mxu2 %vm310_vm1, %v2797_v6  ;;  %v1507_v31 = vpop.permute.xlu1 %1506  ;;  %v893_v57 = vpop.f32.mrf.mxu1  ;;  %vm1114_vm9 = vcmp.eq.s32.totalorder %v3358_v35, %v1074_v14  ;;  %v2198_v14 = vld [vmem:[%s4563_s9 + $0x38] sm:$0xff] }
 0x203   :  { %vm1551_vm6 = vcmp.eq.s32.totalorder %v3358_v35, %v1507_v31  ;;  %v969_v54 = vadd.f32 %v893_v57, %v530_v55  ;;  %v1771_v6 = vpop.f32.mrf.mxu3  ;;  %v1914_v21 = vmax.f32 %v1882_v12, 0.0  ;;  %v2800_v17 = vsel %vm1114_vm9, 1.0, %v3147_v39  ;;  %2307 = vmatpush.msrb.mxu0 %v2198_v14 }
 0x204   :  { %v2862_v62 = vsel %vm1551_vm6, 1.0, %v3147_v39 }
 0x205   :  { %v1408_v44 = vadd.f32 %v1332_v3, %v969_v54 }
 0x206   :  { %v460_v28 = vpop.f32.mrf.mxu0 }
 0x207   :  { %v1847_v46 = vadd.f32 %v1771_v6, %v1408_v44  ;;  %v532_v51 = vadd.f32 %v460_v28, %v90_v25  ;;  %v91_v6 = vld [vmem:[%s4561_s0 + $0x68] sm:$0xff] }
 0x208   :  { %2908 = vmatmul.msk.f32.gmra.mxu1 %vm1949_vm5, %v1912_v23  ;;  %v1335_v23 = vpop.f32.mrf.mxu2  ;;  %v2196_v28 = vld [vmem:[%s4563_s9 + $0x28] sm:$0xff] }
 0x209   :  { %2893 = vmatmul.msk.f32.gmra.mxu3 %vm310_vm1, %v2861_v1  ;;  %v1883_v47 = vadd.f32 %v4059_v45, %v1847_v46  ;;  %v1516_v3 = vpop.permute.xlu2 %1515 }
 0x20a   :  { %2830 = vmatmul.msk.f32.gmra.mxu2 %vm310_vm1, %v2798_v34  ;;  %v1510_v10 = vpop.permute.xlu1 %1509  ;;  %v896_v19 = vpop.f32.mrf.mxu1  ;;  %vm1554_vm12 = vcmp.eq.s32.totalorder %v3358_v35, %v1516_v3 }
 0x20b   :  { %vm1552_vm8 = vcmp.eq.s32.totalorder %v3358_v35, %v1510_v10  ;;  %v970_v30 = vadd.f32 %v896_v19, %v531_v18  ;;  %v1513_v34 = vpop.permute.xlu0 %1512  ;;  %v1774_v1 = vpop.f32.mrf.mxu3  ;;  %v1915_v57 = vmax.f32 %v1883_v47, 0.0  ;;  %v2197_v19 = vld [vmem:[%s4563_s9 + $0x30] sm:$0xff]  ;;  %v2865_v25 = vsel %vm1554_vm12, 1.0, %v3147_v39 }
 0x20c   :  { %v2863_v31 = vsel %vm1552_vm8, 1.0, %v3147_v39  ;;  %vm1553_vm10 = vcmp.eq.s32.totalorder %v3358_v35, %v1513_v34  ;;  %2308 = vmatpush.msrb.mxu0 %v2197_v19  ;;  %vm2637_vm12 = vcmp.lt.s32.totalorder %v110_v33, 256 }
 0x20d   :  { %v1409_v50 = vadd.f32 %v1335_v23, %v970_v30 }
 0x20e   :  { %2309 = vmatpush.msrb.mxu0 %v2196_v28 }
 0x210   :  { %2909 = vmatmul.msk.f32.gmra.mxu1 %vm1949_vm5, %v1913_v59  ;;  %v1848_v59 = vadd.f32 %v1774_v1, %v1409_v50  ;;  %v1338_v4 = vpop.f32.mrf.mxu2 }
 0x211   :  { %2894 = vmatmul.msk.f32.gmra.mxu3 %vm310_vm1, %v2862_v62  ;;  %v2864_v62 = vsel %vm1553_vm10, 1.0, %v3147_v39 }
 0x212   :  { %2831 = vmatmul.msk.f32.gmra.mxu2 %vm310_vm1, %v2799_v16  ;;  %v899_v55 = vpop.f32.mrf.mxu1  ;;  %v463_v16 = vpop.f32.mrf.mxu0  ;;  %v1884_v10 = vadd.f32 %v4059_v45, %v1848_v59  ;;  %v2194_v59 = vld [vmem:[%s4563_s9 + $0x18] sm:$0xff] }
 0x213   :  { %v1077_v40 = vpop.permute.xlu1 %1076  ;;  %v971_v60 = vadd.f32 %v899_v55, %v532_v51  ;;  %v1777_v29 = vpop.f32.mrf.mxu3  ;;  %v533_v18 = vadd.f32 %v463_v16, %v91_v6 }
 0x214   :  { %vm1115_vm11 = vcmp.eq.s32.totalorder %v3358_v35, %v1077_v40  ;;  %v1916_v46 = vmax.f32 %v1884_v10, 0.0  ;;  %v2195_v40 = vld [vmem:[%s4563_s9 + $0x20] sm:$0xff]  ;;  %v1083_v51 = vpop.permute.xlu0 %1082 }
 0x215   :  { %v2801_v54 = vsel %vm1115_vm11, 1.0, %v3147_v39  ;;  %v1410_v12 = vadd.f32 %v1338_v4, %v971_v60  ;;  %2310 = vmatpush.msrb.mxu0 %v2195_v40  ;;  %vm1117_vm14 = vcmp.eq.s32.totalorder %v3358_v35, %v1083_v51  ;;  %vm2632_vm11 = vcmask 1040384  }
 0x216   :  { %v2803_v10 = vsel %vm1117_vm14, 1.0, %v3147_v39 }
 0x217   :  { %v1849_v23 = vadd.f32 %v1777_v29, %v1410_v12  ;;  %2311 = vmatpush.msrb.mxu0 %v2194_v59  ;;  %v2192_v29 = vld [vmem:[%s4563_s9 + $0x8] sm:$0xff] }
 0x218   :  { %2910 = vmatmul.msk.f32.gmra.mxu1 %vm1949_vm5, %v1914_v21  ;;  %v1341_v30 = vpop.f32.mrf.mxu2 }
 0x219   :  { %2895 = vmatmul.msk.f32.gmra.mxu3 %vm310_vm1, %v2863_v31  ;;  %v92_v31 = vld [vmem:[%s4561_s0 + $0x70] sm:$0xff]  ;;  %v1885_v55 = vadd.f32 %v4059_v45, %v1849_v23 }
 0x21a   :  { %2832 = vmatmul.msk.f32.gmra.mxu2 %vm310_vm1, %v2800_v17  ;;  %v902_v21 = vpop.f32.mrf.mxu1  ;;  %v1519_v17 = vpop.permute.xlu2 %1518 }
 0x21b   :  { %v1080_v44 = vpop.permute.xlu1 %1079  ;;  %v972_v1 = vadd.f32 %v902_v21, %v533_v18  ;;  %vm1555_vm15 = vcmp.eq.s32.totalorder %v3358_v35, %v1519_v17  ;;  %v1917_v4 = vmax.f32 %v1885_v55, 0.0  ;;  %v93_v18 = vld [vmem:[%s4561_s0 + $0x78] sm:$0xff]  ;;  %v94_v55 = vld [vmem:[%s4561_s0 + $0x80] sm:$0xff] }
 0x21c   :  { %vm1116_vm13 = vcmp.eq.s32.totalorder %v3358_v35, %v1080_v44  ;;  %v2866_v12 = vsel %vm1555_vm15, 1.0, %v3147_v39  ;;  %v2191_v44 = vld [vmem:[%s4563_s9] sm:$0xff] }
 0x21d   :  { %v2802_v50 = vsel %vm1116_vm13, 1.0, %v3147_v39  ;;  %v1411_v60 = vadd.f32 %v1341_v30, %v972_v1 }
 0x21e   :  { %v1780_v47 = vpop.f32.mrf.mxu3 }
 0x21f   :  { %v1850_v16 = vadd.f32 %v1780_v47, %v1411_v60 }
 0x220   :  { %2911 = vmatmul.msk.f32.gmra.mxu1 %vm1949_vm5, %v1915_v57  ;;  %v1344_v6 = vpop.f32.mrf.mxu2 }
 0x221   :  { %2896 = vmatmul.msk.f32.gmra.mxu3 %vm310_vm1, %v2864_v62  ;;  %v466_v34 = vpop.f32.mrf.mxu0  ;;  %v2193_v62 = vld [vmem:[%s4563_s9 + $0x10] sm:$0xff] }
 0x222   :  { %2833 = vmatmul.msk.f32.gmra.mxu2 %vm310_vm1, %v2801_v54  ;;  %v534_v57 = vadd.f32 %v466_v34, %v92_v31  ;;  %v905_v3 = vpop.f32.mrf.mxu1  ;;  %2312 = vmatpush.msrb.mxu0 %v2193_v62  ;;  %v1086_v21 = vpop.permute.xlu2 %1085 }
 0x223   :  { %vm1118_vm3 = vcmp.eq.s32.totalorder %v3358_v35, %v1086_v21 }
 0x224   :  { %v973_v54 = vadd.f32 %v905_v3, %v534_v57  ;;  %2313 = vmatpush.msrb.mxu0 %v2192_v29  ;;  %v1522_v14 = vpop.permute.xlu1 %1521  ;;  %v2804_v17 = vsel %vm1118_vm3, 1.0, %v3147_v39 }
 0x225   :  { %vm1556_vm0 = vcmp.eq.s32.totalorder %v3358_v35, %v1522_v14 }
 0x226   :  { %2314 = vmatpush.msrb.mxu0 %v2191_v44  ;;  %v1412_v23 = vadd.f32 %v1344_v6, %v973_v54  ;;  %v2867_v1 = vsel %vm1556_vm0, 1.0, %v3147_v39 }
 0x228   :  { %2912 = vmatmul.msk.f32.gmra.mxu1 %vm1949_vm5, %v1916_v46  ;;  %v1886_v46 = vadd.f32 %v4059_v45, %v1850_v16  ;;  %v1347_v47 = vpop.f32.mrf.mxu2 }
 0x229   :  { %2897 = vmatmul.msk.f32.gmra.mxu3 %vm310_vm1, %v2865_v25  ;;  %v469_v19 = vpop.f32.mrf.mxu0  ;;  %v1783_v25 = vpop.f32.mrf.mxu3 }
 0x22a   :  { %2834 = vmatmul.msk.f32.gmra.mxu2 %vm310_vm1, %v2802_v50  ;;  %v535_v28 = vadd.f32 %v469_v19, %v93_v18  ;;  %v908_v30 = vpop.f32.mrf.mxu1  ;;  %v1918_v31 = vmax.f32 %v1886_v46, 0.0  ;;  %v1851_v34 = vadd.f32 %v1783_v25, %v1412_v23  ;;  %v95_v46 = vld [vmem:[%s4561_s0 + $0x88] sm:$0xff] }
 0x22c   :  { %v974_v40 = vadd.f32 %v908_v30, %v535_v28  ;;  %v1887_v50 = vadd.f32 %v4059_v45, %v1851_v34  ;;  %v1525_v51 = vpop.permute.xlu1 %1524  ;;  %v537_v30 = vadd.f32 %v3717_v61, %v95_v46 }
 0x22d   :  { %vm1557_vm4 = vcmp.eq.s32.totalorder %v3358_v35, %v1525_v51 }
 0x22e   :  { %v1413_v60 = vadd.f32 %v1347_v47, %v974_v40  ;;  %v2868_v54 = vsel %vm1557_vm4, 1.0, %v3147_v39  ;;  %v4257_v39 = vld [vmem:[%s4562_s8] ss:$0 sm:$0xff] }
 0x230   :  { %2913 = vmatmul.msk.f32.gmra.mxu1 %vm1949_vm5, %v1917_v4  ;;  %v1919_v4 = vmax.f32 %v1887_v50, 0.0 }
 0x231   :  { %2898 = vmatmul.msk.f32.gmra.mxu3 %vm310_vm1, %v2866_v12  ;;  %v472_v57 = vpop.f32.mrf.mxu0 }
 0x232   :  { %2835 = vmatmul.msk.f32.gmra.mxu2 %vm310_vm1, %v2803_v10  ;;  %v536_v62 = vadd.f32 %v472_v57, %v94_v55  ;;  %v911_v3 = vpop.f32.mrf.mxu1 }
 0x234   :  { %v975_v29 = vadd.f32 %v911_v3, %v536_v62  ;;  %v97_v3 = vld [vmem:[%s4561_s0 + $0x98] sm:$0xff] }
 0x238   :  { %2914 = vmatmul.msk.f32.gmra.mxu1 %vm1949_vm5, %v1918_v31 }
 0x239   :  { %2899 = vmatmul.msk.f32.gmra.mxu3 %vm310_vm1, %v2867_v1  ;;  %v1786_v59 = vpop.f32.mrf.mxu3  ;;  %v96_v1 = vld [vmem:[%s4561_s0 + $0x90] sm:$0xff] }
 0x23a   :  { %2836 = vmatmul.msk.f32.gmra.mxu2 %vm310_vm1, %v2804_v17  ;;  %v1852_v16 = vadd.f32 %v1786_v59, %v1413_v60  ;;  %v538_v47 = vadd.f32 %v3733_v8, %v96_v1 }
 0x23c   :  { %v1888_v6 = vadd.f32 %v4059_v45, %v1852_v16  ;;  %v977_v60 = vadd.f32 %v3746_v32, %v538_v47  ;;  %v539_v16 = vadd.f32 %v3757_v43, %v97_v3 }
 0x23e   :  { %v1920_v18 = vmax.f32 %v1888_v6, 0.0 }
 0x240   :  { %2915 = vmatmul.msk.f32.gmra.mxu1 %vm1949_vm5, %v1919_v4 }
 0x241   :  { %2900 = vmatmul.msk.f32.gmra.mxu3 %vm310_vm1, %v2868_v54  ;;  %v1789_v14 = vpop.f32.mrf.mxu3 }
 0x242   :  { %v1350_v10 = vpop.f32.mrf.mxu2 }
 0x243   :  { %v1414_v12 = vadd.f32 %v1350_v10, %v975_v29 }
 0x245   :  { %v914_v44 = vpop.f32.mrf.mxu1  ;;  %v1853_v19 = vadd.f32 %v1789_v14, %v1414_v12 }
 0x246   :  { %v976_v34 = vadd.f32 %v914_v44, %v537_v30  ;;  %v978_v44 = vadd.f32 %v3765_v20, %v539_v16 }
 0x247   :  { %v1889_v35 = vadd.f32 %v4059_v45, %v1853_v19 }
 0x248   :  { %2916 = vmatmul.msk.f32.gmra.mxu1 %vm1949_vm5, %v1920_v18  ;;  %v98_v18 = vld [vmem:[%s4561_s0 + $0xa0] sm:$0xff] }
 0x249   :  { %v1921_v25 = vmax.f32 %v1889_v35, 0.0  ;;  %v540_v35 = vadd.f32 %v3778_v22, %v98_v18 }
 0x24a   :  { %v1353_v21 = vpop.f32.mrf.mxu2 }
 0x24b   :  { %v1415_v17 = vadd.f32 %v1353_v21, %v976_v34  ;;  %v99_v34 = vld [vmem:[%s4561_s0 + $0xa8] sm:$0xff] }
 0x24d   :  { %v2063_v23 = vpop.f32.mrf.mxu1 }
 0x24e   :  { %v2064_v28 = vadd.f32 %v4257_v39, %v2063_v23 }
 0x250   :  { %v2159_v31 = vmax.f32 %v2064_v28, 0.0  ;;  %2917 = vmatmul.msk.f32.gmra.mxu1 %vm1949_vm5, %v1921_v25 }
 0x252   :  { %2933 = vmatmul.msk.f32.vlgmr.msrb.gmra.mxu0 %vm1949_vm5, %v2159_v31  ;;  %v1356_v50 = vpop.f32.mrf.mxu2  ;;  %v979_v31 = vadd.f32 %v3785_v26, %v540_v35 }
 0x253   :  { %v1416_v4 = vadd.f32 %v1356_v50, %v977_v60 }
 0x254   :  { %v1792_v40 = vpop.f32.mrf.mxu3 }
 0x255   :  { %v1854_v51 = vadd.f32 %v1792_v40, %v1415_v17  ;;  %v2066_v55 = vpop.f32.mrf.mxu1  ;;  %v541_v17 = vadd.f32 %v3796_v27, %v99_v34 }
 0x256   :  { %v2067_v57 = vadd.f32 %v4257_v39, %v2066_v55 }
 0x257   :  { %v1890_v61 = vadd.f32 %v4059_v45, %v1854_v51 }
 0x258   :  { %v2160_v59 = vmax.f32 %v2067_v57, 0.0 }
 0x259   :  { %v1922_v62 = vmax.f32 %v1890_v61, 0.0  ;;  %v980_v61 = vadd.f32 %v3806_v7, %v541_v17  ;;  %v103_v17 = vld [vmem:[%s4561_s0 + $0xc8] sm:$0xff] }
 0x25a   :  { %2934 = vmatmul.msk.f32.gmra.mxu0 %vm1949_vm5, %v2160_v59  ;;  %v100_v59 = vld [vmem:[%s4561_s0 + $0xb0] sm:$0xff] }
 0x25b   :  { %2918 = vmatmul.msk.f32.gmra.mxu1 %vm1949_vm5, %v1922_v62  ;;  %v542_v62 = vadd.f32 %v3820_v38, %v100_v59 }
 0x25c   :  { %v1795_v8 = vpop.f32.mrf.mxu3 }
 0x25d   :  { %v1855_v54 = vadd.f32 %v1795_v8, %v1416_v4  ;;  %v1359_v29 = vpop.f32.mrf.mxu2  ;;  %v2069_v6 = vpop.f32.mrf.mxu1 }
 0x25e   :  { %v2070_v10 = vadd.f32 %v4257_v39, %v2069_v6  ;;  %v1417_v19 = vadd.f32 %v1359_v29, %v978_v44  ;;  %v981_v6 = vadd.f32 %v3831_v42, %v542_v62 }
 0x25f   :  { %v1891_v32 = vadd.f32 %v4059_v45, %v1855_v54 }
 0x260   :  { %v2161_v12 = vmax.f32 %v2070_v10, 0.0  ;;  %v101_v10 = vld [vmem:[%s4561_s0 + $0xb8] sm:$0xff] }
 0x261   :  { %v1923_v14 = vmax.f32 %v1891_v32, 0.0 }
 0x262   :  { %2935 = vmatmul.msk.f32.gmra.mxu0 %vm1949_vm5, %v2161_v12  ;;  %v543_v12 = vadd.f32 %v3844_v49, %v101_v10 }
 0x263   :  { %2919 = vmatmul.msk.f32.gmra.mxu1 %vm1949_vm5, %v1923_v14 }
 0x264   :  { %v1798_v43 = vpop.f32.mrf.mxu3 }
 0x265   :  { %v1856_v21 = vadd.f32 %v1798_v43, %v1417_v19  ;;  %v1362_v46 = vpop.f32.mrf.mxu2  ;;  %v2072_v23 = vpop.f32.mrf.mxu1 }
 0x266   :  { %v2073_v25 = vadd.f32 %v4257_v39, %v2072_v23  ;;  %v1418_v1 = vadd.f32 %v1362_v46, %v979_v31  ;;  %v102_v46 = vld [vmem:[%s4561_s0 + $0xc0] sm:$0xff] }
 0x267   :  { %v1892_v28 = vadd.f32 %v4059_v45, %v1856_v21  ;;  %v982_v21 = vadd.f32 %v3857_v53, %v543_v12 }
 0x268   :  { %v2162_v20 = vmax.f32 %v2073_v25, 0.0  ;;  %v544_v25 = vadd.f32 %v3867_v58, %v102_v46 }
 0x269   :  { %v1924_v30 = vmax.f32 %v1892_v28, 0.0 }
 0x26a   :  { %2936 = vmatmul.msk.f32.gmra.mxu0 %vm1949_vm5, %v2162_v20 }
 0x26b   :  { %2920 = vmatmul.msk.f32.gmra.mxu1 %vm1949_vm5, %v1924_v30 }
 0x26c   :  { %v1801_v22 = vpop.f32.mrf.mxu3 }
 0x26d   :  { %v1857_v40 = vadd.f32 %v1801_v22, %v1418_v1  ;;  %v1365_v47 = vpop.f32.mrf.mxu2  ;;  %v2075_v50 = vpop.f32.mrf.mxu1  ;;  %v983_v22 = vadd.f32 %v3880_v63, %v544_v25 }
 0x26e   :  { %v2076_v51 = vadd.f32 %v4257_v39, %v2075_v50  ;;  %v1419_v60 = vadd.f32 %v1365_v47, %v980_v61  ;;  %v545_v47 = vadd.f32 %v3889_v11, %v103_v17 }
 0x26f   :  { %v1893_v55 = vadd.f32 %v4059_v45, %v1857_v40 }
 0x270   :  { %v2163_v26 = vmax.f32 %v2076_v51, 0.0  ;;  %v984_v59 = vadd.f32 %v3900_v15, %v545_v47 }
 0x271   :  { %v1925_v57 = vmax.f32 %v1893_v55, 0.0 }
 0x272   :  { %2937 = vmatmul.msk.f32.gmra.mxu0 %vm1949_vm5, %v2163_v26 }
 0x273   :  { %2921 = vmatmul.msk.f32.gmra.mxu1 %vm1949_vm5, %v1925_v57 }
 0x274   :  { %v1804_v27 = vpop.f32.mrf.mxu3 }
 0x275   :  { %v1858_v3 = vadd.f32 %v1804_v27, %v1419_v60  ;;  %v1368_v4 = vpop.f32.mrf.mxu2  ;;  %v2078_v8 = vpop.f32.mrf.mxu1  ;;  %v104_v60 = vld [vmem:[%s4561_s0 + $0xd0] sm:$0xff] }
 0x276   :  { %v2079_v16 = vadd.f32 %v4257_v39, %v2078_v8  ;;  %v1420_v32 = vadd.f32 %v1368_v4, %v981_v6  ;;  %v546_v62 = vadd.f32 %v3907_v2, %v104_v60  ;;  %v105_v6 = vld [vmem:[%s4561_s0 + $0xd8] sm:$0xff] }
 0x277   :  { %v1894_v54 = vadd.f32 %v4059_v45, %v1858_v3 }
 0x278   :  { %v2164_v7 = vmax.f32 %v2079_v16, 0.0 }
 0x279   :  { %v1926_v29 = vmax.f32 %v1894_v54, 0.0 }
 0x27a   :  { %2938 = vmatmul.msk.f32.gmra.mxu0 %vm1949_vm5, %v2164_v7 }
 0x27b   :  { %2922 = vmatmul.msk.f32.gmra.mxu1 %vm1949_vm5, %v1926_v29  ;;  %v985_v29 = vadd.f32 %v3916_v24, %v546_v62  ;;  %v109_v62 = vld [vmem:[%s4561_s0 + $0xf8] sm:$0xff] }
 0x27c   :  { %v1807_v38 = vpop.f32.mrf.mxu3 }
 0x27d   :  { %v1859_v14 = vadd.f32 %v1807_v38, %v1420_v32  ;;  %v1371_v44 = vpop.f32.mrf.mxu2  ;;  %v2081_v18 = vpop.f32.mrf.mxu1  ;;  %v547_v32 = vadd.f32 %v3928_v37, %v105_v6 }
 0x27e   :  { %v2082_v19 = vadd.f32 %v4257_v39, %v2081_v18  ;;  %v1421_v23 = vadd.f32 %v1371_v44, %v982_v21 }
 0x27f   :  { %v1895_v43 = vadd.f32 %v4059_v45, %v1859_v14 }
 0x280   :  { %v2165_v42 = vmax.f32 %v2082_v19, 0.0 }
 0x281   :  { %v1927_v35 = vmax.f32 %v1895_v43, 0.0  ;;  %v986_v43 = vadd.f32 %v3932_v0, %v547_v32 }
 0x282   :  { %2939 = vmatmul.msk.f32.gmra.mxu0 %vm1949_vm5, %v2165_v42  ;;  %v106_v42 = vld [vmem:[%s4561_s0 + $0xe0] sm:$0xff] }
 0x283   :  { %2923 = vmatmul.msk.f32.gmra.mxu1 %vm1949_vm5, %v1927_v35  ;;  %v548_v21 = vadd.f32 %v3943_v48, %v106_v42 }
 0x284   :  { %v1810_v49 = vpop.f32.mrf.mxu3 }
 0x285   :  { %v1860_v28 = vadd.f32 %v1810_v49, %v1421_v23  ;;  %v1374_v20 = vpop.f32.mrf.mxu2  ;;  %v2084_v30 = vpop.f32.mrf.mxu1 }
 0x286   :  { %v2085_v31 = vadd.f32 %v4257_v39, %v2084_v30  ;;  %v1422_v40 = vadd.f32 %v1374_v20, %v983_v22  ;;  %v987_v30 = vadd.f32 %v3951_v56, %v548_v21 }
 0x287   :  { %v1896_v34 = vadd.f32 %v4059_v45, %v1860_v28 }
 0x288   :  { %v2166_v53 = vmax.f32 %v2085_v31, 0.0  ;;  %v107_v31 = vld [vmem:[%s4561_s0 + $0xe8] sm:$0xff] }
 0x289   :  { %v1928_v1 = vmax.f32 %v1896_v34, 0.0 }
 0x28a   :  { %2940 = vmatmul.msk.f32.gmra.mxu0 %vm1949_vm5, %v2166_v53  ;;  %v549_v53 = vadd.f32 %v3961_v36, %v107_v31 }
 0x28b   :  { %2924 = vmatmul.msk.f32.gmra.mxu1 %vm1949_vm5, %v1928_v1 }
 0x28c   :  { %v1813_v58 = vpop.f32.mrf.mxu3 }
 0x28d   :  { %v1861_v50 = vadd.f32 %v1813_v58, %v1422_v40  ;;  %v1377_v51 = vpop.f32.mrf.mxu2  ;;  %v2087_v55 = vpop.f32.mrf.mxu1 }
 0x28e   :  { %v2088_v26 = vadd.f32 %v4257_v39, %v2087_v55  ;;  %v1423_v27 = vadd.f32 %v1377_v51, %v984_v59  ;;  %v108_v51 = vld [vmem:[%s4561_s0 + $0xf0] sm:$0xff] }
 0x28f   :  { %v1897_v57 = vadd.f32 %v4059_v45, %v1861_v50  ;;  %v988_v50 = vadd.f32 %v3968_v9, %v549_v53  ;;  %v3142_v9 = vld [vmem:[%s4559_s6] ss:$0 sm:$0xff] }
 0x290   :  { %v2167_v63 = vmax.f32 %v2088_v26, 0.0  ;;  %v550_v26 = vadd.f32 %v3977_v13, %v108_v51 }
 0x291   :  { %v1929_v61 = vmax.f32 %v1897_v57, 0.0 }
 0x292   :  { %2941 = vmatmul.msk.f32.gmra.mxu0 %vm1949_vm5, %v2167_v63 }
 0x293   :  { %2925 = vmatmul.msk.f32.gmra.mxu1 %vm1949_vm5, %v1929_v61 }
 0x294   :  { %v1816_v11 = vpop.f32.mrf.mxu3 }
 0x295   :  { %v1862_v3 = vadd.f32 %v1816_v11, %v1423_v27  ;;  %v1380_v4 = vpop.f32.mrf.mxu2  ;;  %v2090_v8 = vpop.f32.mrf.mxu1  ;;  %v989_v11 = vadd.f32 %v3996_v5, %v550_v26 }
 0x296   :  { %v2091_v16 = vadd.f32 %v4257_v39, %v2090_v8  ;;  %v1424_v10 = vadd.f32 %v1380_v4, %v985_v29  ;;  %v551_v4 = vadd.f32 %v4012_v41, %v109_v62 }
 0x297   :  { %v1898_v54 = vadd.f32 %v4059_v45, %v1862_v3 }
 0x298   :  { %v2168_v15 = vmax.f32 %v2091_v16, 0.0  ;;  %v990_v6 = vadd.f32 %v4025_v52, %v551_v4 }
 0x299   :  { %v1930_v7 = vmax.f32 %v1898_v54, 0.0 }
 0x29a   :  { %2942 = vmatmul.msk.f32.gmra.mxu0 %vm1949_vm5, %v2168_v15 }
 0x29b   :  { %2926 = vmatmul.msk.f32.gmra.mxu1 %vm1949_vm5, %v1930_v7 }
 0x29c   :  { %v1819_v2 = vpop.f32.mrf.mxu3 }
 0x29d   :  { %v1863_v38 = vadd.f32 %v1819_v2, %v1424_v10  ;;  %v1383_v12 = vpop.f32.mrf.mxu2  ;;  %v2093_v14 = vpop.f32.mrf.mxu1 }
 0x29e   :  { %v2094_v44 = vadd.f32 %v4257_v39, %v2093_v14  ;;  %v1425_v35 = vadd.f32 %v1383_v12, %v986_v43 }
 0x29f   :  { %v1899_v18 = vadd.f32 %v4059_v45, %v1863_v38 }
 0x2a0   :  { %v2169_v24 = vmax.f32 %v2094_v44, 0.0 }
 0x2a1   :  { %v1931_v19 = vmax.f32 %v1899_v18, 0.0 }
 0x2a2   :  { %2943 = vmatmul.msk.f32.gmra.mxu0 %vm1949_vm5, %v2169_v24 }
 0x2a3   :  { %2927 = vmatmul.msk.f32.gmra.mxu1 %vm1949_vm5, %v1931_v19 }
 0x2a4   :  { %v1822_v37 = vpop.f32.mrf.mxu3 }
 0x2a5   :  { %v1864_v46 = vadd.f32 %v1822_v37, %v1425_v35  ;;  %v1386_v23 = vpop.f32.mrf.mxu2  ;;  %v2096_v49 = vpop.f32.mrf.mxu1 }
 0x2a6   :  { %v2097_v25 = vadd.f32 %v4257_v39, %v2096_v49  ;;  %v1426_v34 = vadd.f32 %v1386_v23, %v987_v30 }
 0x2a7   :  { %v1900_v28 = vadd.f32 %v4059_v45, %v1864_v46 }
 0x2a8   :  { %v2170_v0 = vmax.f32 %v2097_v25, 0.0 }
 0x2a9   :  { %v1932_v20 = vmax.f32 %v1900_v28, 0.0 }
 0x2aa   :  { %2944 = vmatmul.msk.f32.gmra.mxu0 %vm1949_vm5, %v2170_v0 }
 0x2ab   :  { %2928 = vmatmul.msk.f32.gmra.mxu1 %vm1949_vm5, %v1932_v20 }
 0x2ac   :  { %v1825_v48 = vpop.f32.mrf.mxu3 }
 0x2ad   :  { %v1865_v1 = vadd.f32 %v1825_v48, %v1426_v34  ;;  %v1389_v22 = vpop.f32.mrf.mxu2  ;;  %v2099_v17 = vpop.f32.mrf.mxu1 }
 0x2ae   :  { %v2100_v40 = vadd.f32 %v4257_v39, %v2099_v17  ;;  %v1427_v55 = vadd.f32 %v1389_v22, %v988_v50 }
 0x2af   :  { %v1901_v58 = vadd.f32 %v4059_v45, %v1865_v1 }
 0x2b0   :  { %v2171_v56 = vmax.f32 %v2100_v40, 0.0 }
 0x2b1   :  { %v1933_v47 = vmax.f32 %v1901_v58, 0.0 }
 0x2b2   :  { %2945 = vmatmul.msk.f32.gmra.mxu0 %vm1949_vm5, %v2171_v56 }
 0x2b3   :  { %2929 = vmatmul.msk.f32.gmra.mxu1 %vm1949_vm5, %v1933_v47 }
 0x2b4   :  { %v1828_v36 = vpop.f32.mrf.mxu3 }
 0x2b5   :  { %v1866_v57 = vadd.f32 %v1828_v36, %v1427_v55  ;;  %v2102_v63 = vpop.f32.mrf.mxu1  ;;  %v1392_v61 = vpop.f32.mrf.mxu2 }
 0x2b6   :  { %v2103_v45 = vadd.f32 %v4257_v39, %v2102_v63  ;;  %v1428_v13 = vadd.f32 %v1392_v61, %v989_v11 }
 0x2b7   :  { %v1902_v59 = vadd.f32 %v3142_v9, %v1866_v57 }
 0x2b8   :  { %v2172_v60 = vmax.f32 %v2103_v45, 0.0 }
 0x2b9   :  { %v1934_v27 = vmax.f32 %v1902_v59, 0.0 }
 0x2ba   :  { %2946 = vmatmul.msk.f32.gmra.mxu0 %vm1949_vm5, %v2172_v60 }
 0x2bb   :  { %2930 = vmatmul.msk.f32.gmra.mxu1 %vm1949_vm5, %v1934_v27 }
 0x2bc   :  { %v1831_v3 = vpop.f32.mrf.mxu3 }
 0x2bd   :  { %v1867_v8 = vadd.f32 %v1831_v3, %v1428_v13  ;;  %v2105_v16 = vpop.f32.mrf.mxu1  ;;  %v1395_v7 = vpop.f32.mrf.mxu2 }
 0x2be   :  { %v2106_v54 = vadd.f32 %v4257_v39, %v2105_v16  ;;  %v1429_v10 = vadd.f32 %v1395_v7, %v990_v6 }
 0x2bf   :  { %v1903_v15 = vadd.f32 %v3142_v9, %v1867_v8 }
 0x2c0   :  { %v2173_v29 = vmax.f32 %v2106_v54, 0.0 }
 0x2c1   :  { %v1935_v5 = vmax.f32 %v1903_v15, 0.0 }
 0x2c2   :  { %2947 = vmatmul.msk.f32.gmra.mxu0 %vm1949_vm5, %v2173_v29 }
 0x2c3   :  { %2931 = vmatmul.msk.f32.gmra.mxu1 %vm1949_vm5, %v1935_v5 }
 0x2c4   :  { %v1834_v2 = vpop.f32.mrf.mxu3 }
 0x2c5   :  { %v1868_v32 = vadd.f32 %v1834_v2, %v1429_v10  ;;  %v2108_v38 = vpop.f32.mrf.mxu1 }
 0x2c6   :  { %v2109_v41 = vadd.f32 %v4257_v39, %v2108_v38 }
 0x2c7   :  { %v1904_v12 = vadd.f32 %v3142_v9, %v1868_v32 }
 0x2c8   :  { %v2174_v14 = vmax.f32 %v2109_v41, 0.0 }
 0x2c9   :  { %v1936_v44 = vmax.f32 %v1904_v12, 0.0 }
 0x2ca   :  { %2948 = vmatmul.msk.f32.gmra.mxu0 %vm1949_vm5, %v2174_v14  ;;  %v4445_v14 = vld [vmem:[%s4564_s10] ss:$0 sm:$0xff] }
 0x2cb   :  { %2932 = vmatmul.msk.f32.gmra.mxu1 %vm1949_vm5, %v1936_v44 }
 0x2cd   :  { %v2111_v18 = vpop.f32.mrf.mxu1 }
 0x2ce   :  { %v2112_v52 = vadd.f32 %v4257_v39, %v2111_v18 }
 0x2cf   :  { %v4397_v24 = vpop.f32.mrf.mxu0 }
 0x2d0   :  { %v2175_v19 = vmax.f32 %v2112_v52, 0.0 }
 0x2d2   :  { %2949 = vmatmul.msk.f32.gmra.mxu0 %vm1949_vm5, %v2175_v19 }
 0x2d7   :  { %v4400_v43 = vpop.f32.mrf.mxu0 }
 0x2d8   :  { %v2114_v42 = vpop.f32.mrf.mxu1 }
 0x2d9   :  { %v2115_v35 = vadd.f32 %v4257_v39, %v2114_v42 }
 0x2db   :  { %v2176_v37 = vmax.f32 %v2115_v35, 0.0 }
 0x2dd   :  { %2950 = vmatmul.msk.f32.gmra.mxu0 %vm1949_vm5, %v2176_v37 }
 0x2df   :  { %v4404_v21 = vpop.f32.mrf.mxu0 }
 0x2e0   :  { %v2117_v46 = vpop.f32.mrf.mxu1 }
 0x2e1   :  { %v2118_v23 = vadd.f32 %v4257_v39, %v2117_v46 }
 0x2e3   :  { %v2177_v49 = vmax.f32 %v2118_v23, 0.0 }
 0x2e5   :  { %2951 = vmatmul.msk.f32.gmra.mxu0 %vm1949_vm5, %v2177_v49 }
 0x2e7   :  { %v4408_v25 = vpop.f32.mrf.mxu0 }
 0x2e8   :  { %v2120_v28 = vpop.f32.mrf.mxu1 }
 0x2e9   :  { %v2121_v0 = vadd.f32 %v4257_v39, %v2120_v28 }
 0x2eb   :  { %v2178_v20 = vmax.f32 %v2121_v0, 0.0 }
 0x2ed   :  { %2952 = vmatmul.msk.f32.gmra.mxu0 %vm1949_vm5, %v2178_v20 }
 0x2ef   :  { %v4412_v30 = vpop.f32.mrf.mxu0 }
 0x2f0   :  { %v2123_v31 = vpop.f32.mrf.mxu1 }
 0x2f1   :  { %v2124_v34 = vadd.f32 %v4257_v39, %v2123_v31 }
 0x2f3   :  { %v2179_v48 = vmax.f32 %v2124_v34, 0.0 }
 0x2f5   :  { %2953 = vmatmul.msk.f32.gmra.mxu0 %vm1949_vm5, %v2179_v48 }
 0x2f7   :  { %v4416_v53 = vpop.f32.mrf.mxu0 }
 0x2f8   :  { %v2126_v1 = vpop.f32.mrf.mxu1 }
 0x2f9   :  { %v2127_v22 = vadd.f32 %v4257_v39, %v2126_v1 }
 0x2fb   :  { %v2180_v17 = vmax.f32 %v2127_v22, 0.0 }
 0x2fd   :  { %2954 = vmatmul.msk.f32.gmra.mxu0 %vm1949_vm5, %v2180_v17 }
 0x2ff   :  { %v4420_v40 = vpop.f32.mrf.mxu0 }
 0x300   :  { %v2129_v58 = vpop.f32.mrf.mxu1 }
 0x301   :  { %v2130_v56 = vadd.f32 %v4257_v39, %v2129_v58 }
 0x303   :  { %v2181_v47 = vmax.f32 %v2130_v56, 0.0 }
 0x305   :  { %2955 = vmatmul.msk.f32.gmra.mxu0 %vm1949_vm5, %v2181_v47 }
 0x307   :  { %v4424_v50 = vpop.f32.mrf.mxu0 }
 0x308   :  { %v2132_v51 = vpop.f32.mrf.mxu1  ;;  %v2338_v47 = vadd.f32 %v4445_v14, %v4424_v50  ;;  %v2329_v50 = vadd.f32 %v4445_v14, %v4412_v30  ;;  %v2320_v30 = vadd.f32 %v4445_v14, %v4400_v43 }
 0x309   :  { %v2133_v55 = vadd.f32 %v4257_v39, %v2132_v51 }
 0x30b   :  { %v2182_v36 = vmax.f32 %v2133_v55, 0.0  ;;  %v2335_v55 = vadd.f32 %v4445_v14, %v4420_v40  ;;  %v2326_v40 = vadd.f32 %v4445_v14, %v4408_v25  ;;  %v2413_v25 = vmax.f32 %v2320_v30, 0.0 }
 0x30d   :  { %2956 = vmatmul.msk.f32.gmra.mxu0 %vm1949_vm5, %v2182_v36  ;;  %v2419_v36 = vmax.f32 %v2338_v47, 0.0 }
 0x30f   :  { %v2340_v26 = vpop.f32.mrf.mxu0 }
 0x310   :  { %v2135_v57 = vpop.f32.mrf.mxu1  ;;  %v2341_v17 = vadd.f32 %v4445_v14, %v2340_v26  ;;  %v2332_v26 = vadd.f32 %v4445_v14, %v4416_v53  ;;  %v2323_v53 = vadd.f32 %v4445_v14, %v4404_v21 }
 0x311   :  { %v2136_v63 = vadd.f32 %v4257_v39, %v2135_v57 }
 0x312   :  { %v2420_v51 = vmax.f32 %v2341_v17, 0.0 }
 0x313   :  { %v2183_v61 = vmax.f32 %v2136_v63, 0.0  ;;  %v2418_v63 = vmax.f32 %v2335_v55, 0.0 }
 0x315   :  { %2957 = vmatmul.msk.f32.gmra.mxu0 %vm1949_vm5, %v2183_v61  ;;  %v2417_v61 = vmax.f32 %v2332_v26, 0.0 }
 0x317   :  { %v2343_v45 = vpop.f32.mrf.mxu0 }
 0x318   :  { %v2138_v9 = vpop.f32.mrf.mxu1  ;;  %v2344_v1 = vadd.f32 %v4445_v14, %v2343_v45 }
 0x319   :  { %v2139_v59 = vadd.f32 %v4257_v39, %v2138_v9  ;;  %v2416_v9 = vmax.f32 %v2329_v50, 0.0 }
 0x31a   :  { %v2421_v58 = vmax.f32 %v2344_v1, 0.0 }
 0x31b   :  { %v2184_v60 = vmax.f32 %v2139_v59, 0.0  ;;  %v2415_v59 = vmax.f32 %v2326_v40, 0.0 }
 0x31d   :  { %2958 = vmatmul.msk.f32.gmra.mxu0 %vm1949_vm5, %v2184_v60 }
 0x31f   :  { %v2346_v27 = vpop.f32.mrf.mxu0 }
 0x320   :  { %v2141_v11 = vpop.f32.mrf.mxu1  ;;  %v2347_v31 = vadd.f32 %v4445_v14, %v2346_v27  ;;  %v2414_v27 = vmax.f32 %v2323_v53, 0.0 }
 0x321   :  { %v2142_v62 = vadd.f32 %v4257_v39, %v2141_v11  ;;  %v2317_v11 = vadd.f32 %v4445_v14, %v4397_v24 }
 0x322   :  { %v2422_v22 = vmax.f32 %v2347_v31, 0.0 }
 0x323   :  { %v2185_v13 = vmax.f32 %v2142_v62, 0.0 }
 0x325   :  { %2959 = vmatmul.msk.f32.gmra.mxu0 %vm1949_vm5, %v2185_v13  ;;  %v2412_v13 = vmax.f32 %v2317_v11, 0.0 }
 0x327   :  { %v2349_v3 = vpop.f32.mrf.mxu0 }
 0x328   :  { %v2144_v4 = vpop.f32.mrf.mxu1 }
 0x329   :  { %v2145_v8 = vadd.f32 %v4257_v39, %v2144_v4 }
 0x32b   :  { %v2186_v16 = vmax.f32 %v2145_v8, 0.0 }
 0x32d   :  { %2960 = vmatmul.msk.f32.gmra.mxu0 %vm1949_vm5, %v2186_v16 }
 0x32f   :  { %v2352_v54 = vpop.f32.mrf.mxu0 }
 0x330   :  { %v2147_v15 = vpop.f32.mrf.mxu1  ;;  %v2353_v49 = vadd.f32 %v4445_v14, %v2352_v54 }
 0x331   :  { %v2148_v7 = vadd.f32 %v4257_v39, %v2147_v15 }
 0x332   :  { %v2424_v20 = vmax.f32 %v2353_v49, 0.0 }
 0x333   :  { %v2187_v29 = vmax.f32 %v2148_v7, 0.0 }
 0x335   :  { %2961 = vmatmul.msk.f32.gmra.mxu0 %vm1949_vm5, %v2187_v29 }
 0x337   :  { %v2355_v5 = vpop.f32.mrf.mxu0 }
 0x338   :  { %v2150_v6 = vpop.f32.mrf.mxu1  ;;  %v2356_v46 = vadd.f32 %v4445_v14, %v2355_v5 }
 0x339   :  { %v2151_v10 = vadd.f32 %v4257_v39, %v2150_v6 }
 0x33a   :  { %v2425_v28 = vmax.f32 %v2356_v46, 0.0 }
 0x33b   :  { %v2188_v2 = vmax.f32 %v2151_v10, 0.0 }
 0x33d   :  { %2962 = vmatmul.msk.f32.gmra.mxu0 %vm1949_vm5, %v2188_v2 }
 0x33f   :  { %v2358_v32 = vpop.f32.mrf.mxu0 }
 0x340   :  { %v2153_v38 = vpop.f32.mrf.mxu1  ;;  %v2359_v42 = vadd.f32 %v4445_v14, %v2358_v32 }
 0x341   :  { %v2154_v41 = vadd.f32 %v4257_v39, %v2153_v38 }
 0x342   :  { %v2426_v23 = vmax.f32 %v2359_v42, 0.0 }
 0x343   :  { %v2189_v12 = vmax.f32 %v2154_v41, 0.0 }
 0x345   :  { %2963 = vmatmul.msk.f32.gmra.mxu0 %vm1949_vm5, %v2189_v12 }
 0x347   :  { %v2361_v44 = vpop.f32.mrf.mxu0 }
 0x348   :  { %v2362_v18 = vadd.f32 %v4445_v14, %v2361_v44  ;;  %v2156_v52 = vpop.f32.mrf.mxu1 }
 0x349   :  { %v2157_v19 = vadd.f32 %v4257_v39, %v2156_v52  ;;  %v2350_v39 = vadd.f32 %v4445_v14, %v2349_v3 }
 0x34a   :  { %v2427_v35 = vmax.f32 %v2362_v18, 0.0  ;;  %v2444_v18 = vld [vmem:[%s4565_s11] sm:$0x1] }
 0x34b   :  { %v2190_v37 = vmax.f32 %v2157_v19, 0.0  ;;  %v2423_v34 = vmax.f32 %v2350_v39, 0.0 }
 0x34c   :  { %2965 = vmatpush.xpose.msk.msra.mxu2 %vm1949_vm5, %v2427_v35 }
 0x34d   :  { %2964 = vmatmul.msk.f32.gmra.mxu0 %vm1949_vm5, %v2190_v37 }
 0x34f   :  { %v4455_v0 = vpop.f32.mrf.mxu0 }
 0x350   :  { %2966 = vmatpush.xpose.msk.msra.mxu2 %vm1949_vm5, %v2426_v23 }
 0x354   :  { %2967 = vmatpush.xpose.msk.msra.mxu2 %vm1949_vm5, %v2425_v28  ;;  %v18_v28 = vstv %s4566_s12 }
 0x355   :  { %19 = vst [vmem:[#allocation2] sm:$0x1] %v18_v28 }
 0x358   :  { %2968 = vmatpush.xpose.msk.msra.mxu2 %vm1949_vm5, %v2424_v20 }
 0x35a   :  { %v4461_v48 = vpop.f32.mrf.mxu0 }
 0x35c   :  { %2969 = vmatpush.xpose.msk.msra.mxu2 %vm1949_vm5, %v2423_v34  ;;  %v2445_v1 = vld [vmem:[#allocation2] sm:$0x1] }
 0x35d   :  { %2448 = vperm.xlu2 %3114, %v2445_v1  }
 0x360   :  { %2970 = vmatpush.xpose.msk.msra.mxu2 %vm1949_vm5, %v2422_v22 }
 0x362   :  { %v4467_v56 = vpop.f32.mrf.mxu0 }
 0x364   :  { %2971 = vmatpush.xpose.msk.msra.mxu2 %vm1949_vm5, %v2421_v58  ;;  %v2371_v58 = vadd.f32 %v4445_v14, %v4467_v56 }
 0x366   :  { %v2430_v55 = vmax.f32 %v2371_v58, 0.0 }
 0x368   :  { %2972 = vmatpush.xpose.msk.msra.mxu2 %vm1949_vm5, %v2420_v51  ;;  %v2368_v51 = vadd.f32 %v4445_v14, %v4461_v48 }
 0x36a   :  { %v4475_v57 = vpop.f32.mrf.mxu0  ;;  %v2429_v26 = vmax.f32 %v2368_v51, 0.0 }
 0x36b   :  { %v2374_v22 = vadd.f32 %v4445_v14, %v4475_v57 }
 0x36c   :  { %2973 = vmatpush.xpose.msk.msra.mxu2 %vm1949_vm5, %v2419_v36  ;;  %v2365_v36 = vadd.f32 %v4445_v14, %v4455_v0 }
 0x36d   :  { %v2431_v47 = vmax.f32 %v2374_v22, 0.0 }
 0x36e   :  { %v2428_v57 = vmax.f32 %v2365_v36, 0.0 }
 0x370   :  { %2974 = vmatpush.xpose.msk.msra.mxu2 %vm1949_vm5, %v2418_v63 }
 0x372   :  { %v4483_v45 = vpop.f32.mrf.mxu0 }
 0x373   :  { %v2377_v31 = vadd.f32 %v4445_v14, %v4483_v45 }
 0x374   :  { %2975 = vmatpush.xpose.msk.msra.mxu2 %vm1949_vm5, %v2417_v61 }
 0x375   :  { %v2432_v17 = vmax.f32 %v2377_v31, 0.0 }
 0x378   :  { %2976 = vmatpush.xpose.msk.msra.mxu2 %vm1949_vm5, %v2416_v9 }
 0x37a   :  { %v2379_v60 = vpop.f32.mrf.mxu0 }
 0x37b   :  { %v2380_v39 = vadd.f32 %v4445_v14, %v2379_v60 }
 0x37c   :  { %2977 = vmatpush.xpose.msk.msra.mxu2 %vm1949_vm5, %v2415_v59 }
 0x37d   :  { %v2433_v34 = vmax.f32 %v2380_v39, 0.0 }
 0x380   :  { %2978 = vmatpush.xpose.msk.msra.mxu2 %vm1949_vm5, %v2414_v27 }
 0x382   :  { %v2382_v62 = vpop.f32.mrf.mxu0 }
 0x383   :  { %v2383_v23 = vadd.f32 %v4445_v14, %v2382_v62 }
 0x384   :  { %2979 = vmatpush.xpose.msk.msra.mxu2 %vm1949_vm5, %v2413_v25 }
 0x385   :  { %v2434_v20 = vmax.f32 %v2383_v23, 0.0 }
 0x388   :  { %2980 = vmatpush.xpose.msk.msra.mxu2 %vm1949_vm5, %v2412_v13 }
 0x38a   :  { %v2385_v21 = vpop.f32.mrf.mxu0 }
 0x38b   :  { %2981 = vmatmul.msk.f32.vlgmr.msra.gmra.mxu2 %vm1949_vm5, %v2444_v18  ;;  %v2386_v37 = vadd.f32 %v4445_v14, %v2385_v21 }
 0x38d   :  { %v2435_v49 = vmax.f32 %v2386_v37, 0.0 }
 0x392   :  { %v2388_v3 = vpop.f32.mrf.mxu0 }
 0x393   :  { %v2389_v42 = vadd.f32 %v4445_v14, %v2388_v3 }
 0x395   :  { %v2436_v46 = vmax.f32 %v2389_v42, 0.0 }
 0x39a   :  { %v2391_v4 = vpop.f32.mrf.mxu0 }
 0x39b   :  { %v2392_v52 = vadd.f32 %v4445_v14, %v2391_v4 }
 0x39d   :  { %v2437_v35 = vmax.f32 %v2392_v52, 0.0 }
 0x3a2   :  { %v2394_v8 = vpop.f32.mrf.mxu0 }
 0x3a3   :  { %v2395_v12 = vadd.f32 %v4445_v14, %v2394_v8 }
 0x3a5   :  { %v2438_v19 = vmax.f32 %v2395_v12, 0.0 }
 0x3aa   :  { %v2397_v16 = vpop.f32.mrf.mxu0 }
 0x3ab   :  { %v2398_v38 = vadd.f32 %v4445_v14, %v2397_v16 }
 0x3ad   :  { %v2439_v44 = vmax.f32 %v2398_v38, 0.0 }
 0x3b2   :  { %v2400_v54 = vpop.f32.mrf.mxu0 }
 0x3b3   :  { %v2401_v2 = vadd.f32 %v4445_v14, %v2400_v54 }
 0x3b5   :  { %v2440_v41 = vmax.f32 %v2401_v2, 0.0 }
 0x3b7   :  { %v2449_v56 = vpop.permute.xlu2 %2448 }
 0x3b8   :  { %v2451_v63 = vperm.slane %v2449_v56, 0 }
 0x3ba   :  { %v2403_v43 = vpop.f32.mrf.mxu0 }
 0x3bb   :  { %v2404_v6 = vadd.f32 %v4445_v14, %v2403_v43 }
 0x3bd   :  { %v2441_v32 = vmax.f32 %v2404_v6, 0.0 }
 0x3c2   :  { %v2406_v15 = vpop.f32.mrf.mxu0 }
 0x3c3   :  { %v2407_v24 = vadd.f32 %v4445_v14, %v2406_v15 }
 0x3c5   :  { %v2442_v10 = vmax.f32 %v2407_v24, 0.0 }
 0x3ca   :  { %v2409_v7 = vpop.f32.mrf.mxu0 }
 0x3cb   :  { %v2410_v29 = vadd.f32 %v4445_v14, %v2409_v7 }
 0x3cd   :  { %v2443_v5 = vmax.f32 %v2410_v29, 0.0 }
 0x3cf   :  { %2982 = vmatpush.xpose.msk.msra.mxu3 %vm1949_vm5, %v2443_v5 }
 0x3d3   :  { %2983 = vmatpush.xpose.msk.msra.mxu3 %vm1949_vm5, %v2442_v10 }
 0x3d7   :  { %2984 = vmatpush.xpose.msk.msra.mxu3 %vm1949_vm5, %v2441_v32 }
 0x3db   :  { %2985 = vmatpush.xpose.msk.msra.mxu3 %vm1949_vm5, %v2440_v41 }
 0x3df   :  { %2986 = vmatpush.xpose.msk.msra.mxu3 %vm1949_vm5, %v2439_v44 }
 0x3e3   :  { %2987 = vmatpush.xpose.msk.msra.mxu3 %vm1949_vm5, %v2438_v19 }
 0x3e7   :  { %2988 = vmatpush.xpose.msk.msra.mxu3 %vm1949_vm5, %v2437_v35 }
 0x3eb   :  { %2989 = vmatpush.xpose.msk.msra.mxu3 %vm1949_vm5, %v2436_v46 }
 0x3ef   :  { %2990 = vmatpush.xpose.msk.msra.mxu3 %vm1949_vm5, %v2435_v49 }
 0x3f3   :  { %2991 = vmatpush.xpose.msk.msra.mxu3 %vm1949_vm5, %v2434_v20 }
 0x3f7   :  { %2992 = vmatpush.xpose.msk.msra.mxu3 %vm1949_vm5, %v2433_v34 }
 0x3fb   :  { %2993 = vmatpush.xpose.msk.msra.mxu3 %vm1949_vm5, %v2432_v17 }
 0x3ff   :  { %2994 = vmatpush.xpose.msk.msra.mxu3 %vm1949_vm5, %v2431_v47 }
 0x403   :  { %2995 = vmatpush.xpose.msk.msra.mxu3 %vm1949_vm5, %v2430_v55 }
 0x407   :  { %2996 = vmatpush.xpose.msk.msra.mxu3 %vm1949_vm5, %v2429_v26 }
 0x40b   :  { %2997 = vmatpush.xpose.msk.msra.mxu3 %vm1949_vm5, %v2428_v57 }
 0x40e   :  { %2998 = vmatmul.msk.f32.vlgmr.msra.gmra.mxu3 %vm1949_vm5, %v2444_v18  ;;  %v2568_v50 = vpop.f32.mrf.mxu2 }
 0x40f   :  { %v2569_v61 = vadd.f32 %v2568_v50, %v2451_v63 }
 0x411   :  { %v2999_v45 = vmul.f32 -1.442695, %v2569_v61 }
 0x413   :  { %3119 = vpow2.f32 %v2999_v45 }
 0x419   :  { %v3120_v48 = vpop.eup %3119 }
 0x41a   :  { %v2597_v40 = vadd.f32 1.0, %v3120_v48 }
 0x41c   :  { %3121 = vrcp.f32 %v2597_v40  ;;  %vm2604_vm1 = vweird.f32 %v2597_v40  ;;  %v2610_v4 = vand.u32 2147483648, %v2597_v40  ;;  %v2608_v54 = vand.u32 2147483647, %v2597_v40 }
 0x41e   :  { %v2611_v29 = vor.u32 1.1754944e-38, %v2610_v4  ;;  %vm2609_vm10 = vcmp.eq.f32.partialorder %v2608_v54, 8.507059e+37 }
 0x422   :  { %v3122_v14 = vpop.eup %3121 }
 0x423   :  { %v2600_v30 = vmul.f32 %v3122_v14, %v2597_v40  ;;  %vm2605_vm5 = vweird.f32 %v3122_v14 }
 0x424   :  { %vm4544_vm6 = vmor %vm2604_vm1, %vm2605_vm5 }
 0x425   :  { %v2601_v27 = vsub.f32 1.0, %v2600_v30 }
 0x427   :  { %v2602_v25 = vmul.f32 %v3122_v14, %v2601_v27 }
 0x429   :  { %v2603_v3 = vadd.f32 %v3122_v14, %v2602_v25 }
 0x42b   :  { %v2607_v5 = vsel %vm4544_vm6, %v3122_v14, %v2603_v3 }
 0x42c   :  { %v2612_v2 = vsel %vm2609_vm10, %v2611_v29, %v2607_v5 }
 0x491   :  { %v2588_v9 = vpop.f32.mrf.mxu3 }
 0x492   :  { %v2589_v53 = vadd.f32 %v2588_v9, %v2451_v63 }
 0x494   :  { %v3000_v59 = vmul.f32 -1.442695, %v2589_v53 }
 0x496   :  { %3123 = vpow2.f32 %v3000_v59 }
 0x49c   :  { %v3124_v0 = vpop.eup %3123 }
 0x49d   :  { %v2598_v60 = vadd.f32 1.0, %v3124_v0 }
 0x49f   :  { %3125 = vrcp.f32 %v2598_v60  ;;  %v2625_v21 = vand.u32 2147483648, %v2598_v60  ;;  %v2623_v16 = vand.u32 2147483647, %v2598_v60  ;;  %vm2619_vm7 = vweird.f32 %v2598_v60 }
 0x4a1   :  { %v2626_v7 = vor.u32 1.1754944e-38, %v2625_v21  ;;  %vm2624_vm9 = vcmp.eq.f32.partialorder %v2623_v16, 8.507059e+37 }
 0x4a5   :  { %v3126_v11 = vpop.eup %3125 }
 0x4a6   :  { %v2615_v62 = vmul.f32 %v3126_v11, %v2598_v60  ;;  %vm2620_vm2 = vweird.f32 %v3126_v11 }
 0x4a7   :  { %vm2621_vm8 = vmor %vm2619_vm7, %vm2620_vm2 }
 0x4a8   :  { %v2616_v13 = vsub.f32 1.0, %v2615_v62 }
 0x4aa   :  { %v2617_v8 = vmul.f32 %v3126_v11, %v2616_v13 }
 0x4ac   :  { %v2618_v15 = vadd.f32 %v3126_v11, %v2617_v8 }
 0x4ae   :  { %v2622_v24 = vsel %vm2621_vm8, %v3126_v11, %v2618_v15 }
 0x4af   :  { %v2627_v6 = vsel %vm2624_vm9, %v2626_v7, %v2622_v24 }
 0x4b0   :  { %v2631_v10 = vrot.slane %v2627_v6, 7 }
 0x4b2   :  { %v2633_v32 = vsel %vm2632_vm11, %v2612_v2, %v2631_v10 }
 0x4b3   :  { %2639 = vst.msk [vmem:[%s4567_s13] sm:$0x3] %vm2637_vm12, %v2633_v32 }

</bundles_post_ra>
